<compile_context>
chip_gen: v7x
topology: tpu7x:2x2x1
jax: 0.10.0
libtpu: 0.0.40
codegen_flags: <defaults>
</compile_context>

<pallas_src>
import jax
import jax.numpy as jnp
from jax.experimental import pallas as pl
from jax.experimental.pallas import tpu as pltpu


# ---------------------------------------------------------------------------
# Kernel
# ---------------------------------------------------------------------------
def aita_lstm_kernel(x_ref, wih_ref, whh_ref, b_ref, wfc_ref, bfc_ref,
                     out_ref, seq_ref, pre_ref):
    """Fused multi-layer LSTM + fc + sigmoid.  Grid = (batch_blocks, n_layers).

    x_ref   : (T, B_blk, H)   f32   time-major embedded input block (E == H, padded)
    wih_ref : (1, H, 4H)      bf16  this layer's input->gates weights (transposed)
    whh_ref : (1, H, 4H)      bf16  this layer's hidden->gates weights (transposed)
    b_ref   : (1, 1, 4H)      f32   this layer's combined bias (b_ih + b_hh)
    wfc_ref : (H, O)          bf16  fc weight (transposed), O lane-padded
    bfc_ref : (1, O)          f32   fc bias
    out_ref : (B_blk, O)      f32   sigmoid(fc(h_T)) — written on the last layer only
    seq_ref : (T, B_blk, H)   f32   scratch: current layer's output sequence
    pre_ref : (T, B_blk, 4H)  f32   scratch: hoisted input-projection pre-gates
    """
    T, B_blk, H = seq_ref.shape
    G = 4 * H
    l = pl.program_id(1)
    n_layers = pl.num_programs(1)

    wih = wih_ref[0]          # (H, 4H) bf16
    whh = whh_ref[0]          # (H, 4H) bf16
    b = b_ref[0]              # (1, 4H) f32

    # Layer input: embedded tokens for layer 0, previous layer's outputs after.
    @pl.when(l == 0)
    def _():
        seq_ref[...] = x_ref[...]
    inp = seq_ref[...]                                           # (T, B_blk, H) f32

    # Hoisted input projection: ONE MXU matmul (bf16 operands, f32 accumulate)
    # for ALL timesteps of this layer.
    inp2 = inp.reshape(T * B_blk, H).astype(jnp.bfloat16)
    pre = jnp.dot(inp2, wih, preferred_element_type=jnp.float32)  # (T*B_blk, 4H) f32
    pre_ref[...] = pre.reshape(T, B_blk, G) + b

    # Initial hidden/cell state = zeros (init_hidden semantics), carried as
    # f32 values (vregs) across the time loop.
    h0 = jnp.zeros((B_blk, H), jnp.float32)
    c0 = jnp.zeros((B_blk, H), jnp.float32)

    def step(t, carry):
        h, c = carry
        # Recurrent matmul on the critical path: bf16 operands, f32 accumulate.
        gates = pre_ref[t] + jnp.dot(h.astype(jnp.bfloat16), whh,
                                     preferred_element_type=jnp.float32)  # (B_blk, 4H)
        # H is lane-padded to a multiple of 128 -> aligned, full-vreg slices.
        i_g = jax.nn.sigmoid(gates[:, 0 * H:1 * H])
        f_g = jax.nn.sigmoid(gates[:, 1 * H:2 * H])
        g_g = jnp.tanh(gates[:, 2 * H:3 * H])
        o_g = jax.nn.sigmoid(gates[:, 3 * H:4 * H])
        c_new = f_g * c + i_g * g_g
        h_new = o_g * jnp.tanh(c_new)

        @pl.when(l < n_layers - 1)
        def _():
            # Becomes the next layer's input; off the recurrence's critical
            # path, skipped entirely on the final layer.
            seq_ref[t] = h_new
        return h_new, c_new

    h_T, _ = jax.lax.fori_loop(0, T, step, (h0, c0),
                               unroll=T if T <= 16 else 8)

    @pl.when(l == n_layers - 1)
    def _():
        # fc + sigmoid on the last timestep's hidden state of the last layer.
        logits = (jnp.dot(h_T.astype(jnp.bfloat16), wfc_ref[...],
                          preferred_element_type=jnp.float32)
                  + bfc_ref[...])                                 # (B_blk, O)
        out_ref[...] = jax.nn.sigmoid(logits).astype(out_ref.dtype)


# ---------------------------------------------------------------------------
# Padding helpers (zero-padding is exact for the LSTM recurrence: padded gate
# columns get 0 pre-activations -> padded c/h lanes stay identically 0).
# ---------------------------------------------------------------------------
def _round_up(x, m):
    return (x + m - 1) // m * m


def _pad_gate_mat(w, h, h_pad):
    """(L, H, 4H) gate-ordered (i,f,g,o) -> (L, H_pad, 4*H_pad), zero padded."""
    L, h_in, _ = w.shape
    w4 = w.reshape(L, h_in, 4, h)
    w4 = jnp.pad(w4, ((0, 0), (0, h_pad - h_in), (0, 0), (0, h_pad - h)))
    return w4.reshape(L, h_pad, 4 * h_pad)


def _pad_gate_bias(b, h, h_pad):
    """(L, 1, 4H) -> (L, 1, 4*H_pad), zero padded per gate."""
    L = b.shape[0]
    b4 = b.reshape(L, 1, 4, h)
    b4 = jnp.pad(b4, ((0, 0), (0, 0), (0, 0), (0, h_pad - h)))
    return b4.reshape(L, 1, 4 * h_pad)


def _vmem_limit_bytes(T, B_blk, H_pad, O_pad):
    f32, bf16 = 4, 2
    x_blk = T * B_blk * H_pad * f32
    w_blk = 2 * (H_pad * 4 * H_pad) * bf16 + 4 * H_pad * f32   # wih + whh + bias / layer
    fc = H_pad * O_pad * bf16 + O_pad * f32
    out_blk = B_blk * O_pad * f32
    seq = T * B_blk * H_pad * f32
    pre = T * B_blk * 4 * H_pad * f32
    # pipelined inputs/outputs are double-buffered; scratch is single-buffered
    total = 2 * (x_blk + w_blk + fc + out_blk) + seq + pre + (4 << 20)
    return int(min(100 * 1024 * 1024, max(32 * 1024 * 1024, total)))


# ---------------------------------------------------------------------------
# Wrapper
# ---------------------------------------------------------------------------
def aita_net_forward(tokens, params):
    """tokens: (B, T) int32. Returns (B,) float32 — matches AITA_Net.forward."""
    emb_table = params["embedding"]                  # (V, E)
    emb = emb_table[tokens]                          # (B, T, E) gather in JAX glue
    B, T, E = emb.shape
    L, H, H4 = params["wih"].shape
    O = params["wfc"].shape[1]
    assert E == H and H4 == 4 * H

    # (8,128)-aligned padded sizes.
    H_pad = _round_up(H, 128)
    B_pad = _round_up(B, 8)
    O_pad = _round_up(O, 128)

    # Batch blocking: split across TensorCores (v7x megacore) when each half
    # stays sublane-aligned (>= 8 rows); otherwise one block.
    if B_pad >= 16 and B_pad % 16 == 0:
        B_blk = B_pad // 2
    else:
        B_blk = B_pad
    n_b = B_pad // B_blk

    # Time-major, padded activations (kept f32; cast to bf16 at MXU operands
    # inside the kernel).
    x = jnp.transpose(emb, (1, 0, 2))                             # (T, B, E)
    x = jnp.pad(x, ((0, 0), (0, B_pad - B), (0, H_pad - E)))      # (T, B_pad, H_pad)
    x = x.astype(jnp.float32)

    # Weights: gate-aware zero padding; matmul operands cast to bf16.
    wih = _pad_gate_mat(params["wih"], H, H_pad).astype(jnp.bfloat16)
    whh = _pad_gate_mat(params["whh"], H, H_pad).astype(jnp.bfloat16)
    bias = _pad_gate_bias(params["b"], H, H_pad).astype(jnp.float32)
    wfc = jnp.pad(params["wfc"], ((0, H_pad - H), (0, O_pad - O))).astype(jnp.bfloat16)
    bfc = jnp.pad(params["bfc"], ((0, 0), (0, O_pad - O))).astype(jnp.float32)

    out = pl.pallas_call(
        aita_lstm_kernel,
        out_shape=jax.ShapeDtypeStruct((B_pad, O_pad), jnp.float32),
        grid_spec=pltpu.PrefetchScalarGridSpec(
            num_scalar_prefetch=0,
            grid=(n_b, L),
            in_specs=[
                pl.BlockSpec((T, B_blk, H_pad), lambda i, l: (0, i, 0)),        # x
                pl.BlockSpec((1, H_pad, 4 * H_pad), lambda i, l: (l, 0, 0)),    # wih (streamed per layer)
                pl.BlockSpec((1, H_pad, 4 * H_pad), lambda i, l: (l, 0, 0)),    # whh (streamed per layer)
                pl.BlockSpec((1, 1, 4 * H_pad), lambda i, l: (l, 0, 0)),        # bias
                pl.BlockSpec((H_pad, O_pad), lambda i, l: (0, 0)),              # wfc
                pl.BlockSpec((1, O_pad), lambda i, l: (0, 0)),                  # bfc
            ],
            out_specs=pl.BlockSpec((B_blk, O_pad), lambda i, l: (i, 0)),
            scratch_shapes=[
                pltpu.VMEM((T, B_blk, H_pad), jnp.float32),       # layer output sequence
                pltpu.VMEM((T, B_blk, 4 * H_pad), jnp.float32),   # hoisted pre-gates
            ],
        ),
        compiler_params=pltpu.CompilerParams(
            dimension_semantics=("parallel", "arbitrary"),
            vmem_limit_bytes=_vmem_limit_bytes(T, B_blk, H_pad, O_pad),
        ),
    )(x, wih, whh, bias, wfc, bfc)

    # out = out.view(batch, -1); out = out[:, -1]
    #   -> last output unit (column O-1) at the last timestep, real batch rows only.
    return out[:B, O - 1]


# ---------------------------------------------------------------------------
# Pure-JAX reference (eval mode), unpadded f32
# ---------------------------------------------------------------------------
def ref_forward(tokens, params):
    emb = params["embedding"][tokens]               # (B, T, E)
    B, T, E = emb.shape
    L, H, _ = params["wih"].shape
    x = emb
    for l in range(L):
        h = jnp.zeros((B, H), jnp.float32)
        c = jnp.zeros((B, H), jnp.float32)
        outs = []
        for t in range(T):
            gates = x[:, t, :] @ params["wih"][l] + h @ params["whh"][l] + params["b"][l]
            i_g = jax.nn.sigmoid(gates[:, 0 * H:1 * H])
            f_g = jax.nn.sigmoid(gates[:, 1 * H:2 * H])
            g_g = jnp.tanh(gates[:, 2 * H:3 * H])
            o_g = jax.nn.sigmoid(gates[:, 3 * H:4 * H])
            c = f_g * c + i_g * g_g
            h = o_g * jnp.tanh(c)
            outs.append(h)
        x = jnp.stack(outs, axis=1)                 # (B, T, H)
    logits = x[:, -1, :] @ params["wfc"] + params["bfc"]
    return jax.nn.sigmoid(logits)[:, -1]


def make_params(key, vocab_size, embedding_dim, hidden_dim, n_layers, output_size):
    assert embedding_dim == hidden_dim
    ks = jax.random.split(key, 7)
    H = hidden_dim
    scale = 1.0 / jnp.sqrt(H)
    params = {
        "embedding": jax.random.normal(ks[0], (vocab_size, embedding_dim), jnp.float32),
        # PyTorch weight_ih_l{k}: (4H, in) with gate order (i,f,g,o); stored transposed.
        "wih": jax.random.uniform(ks[1], (n_layers, H, 4 * H), jnp.float32, -scale, scale),
        "whh": jax.random.uniform(ks[2], (n_layers, H, 4 * H), jnp.float32, -scale, scale),
        # combined bias b_ih + b_hh, broadcastable over batch.
        "b": jax.random.uniform(ks[3], (n_layers, 1, 4 * H), jnp.float32, -scale, scale),
        "wfc": jax.random.uniform(ks[4], (H, output_size), jnp.float32, -scale, scale),
        "bfc": jax.random.uniform(ks[5], (1, output_size), jnp.float32, -scale, scale),
    }
    return params


if __name__ == "__main__":
    # Small shapes consistent with the module: token ids -> (B,) sigmoid score.
    VOCAB, EMB, HID, LAYERS, OUT = 50, 32, 32, 2, 1
    B, T = 2, 8

    key = jax.random.PRNGKey(0)
    kp, kx = jax.random.split(key)
    params = make_params(kp, VOCAB, EMB, HID, LAYERS, OUT)
    tokens = jax.random.randint(kx, (B, T), 0, VOCAB, dtype=jnp.int32)

    y = aita_net_forward(tokens, params)
    y = jax.block_until_ready(y)

    y_ref = ref_forward(tokens, params)
    assert y.shape == (B,)
    # bf16 MXU operands -> looser tolerance than the all-f32 version.
    assert jnp.allclose(y, y_ref, atol=2e-2, rtol=2e-2), (y, y_ref)

    print("KERNEL_OK")
</pallas_src>

<mosaic_0001>
module attributes {stable_mosaic.version = 11 : i64} {
  func.func @aita_lstm_kernel(%arg0: i32, %arg1: i32, %arg2: memref<8x8x128xf32, #tpu.memory_space<vmem>>, %arg3: memref<1x128x512xbf16, #tpu.memory_space<vmem>>, %arg4: memref<1x128x512xbf16, #tpu.memory_space<vmem>>, %arg5: memref<1x1x512xf32, #tpu.memory_space<vmem>>, %arg6: memref<128x128xbf16, #tpu.memory_space<vmem>>, %arg7: memref<1x128xf32, #tpu.memory_space<vmem>>, %arg8: memref<8x128xf32, #tpu.memory_space<vmem>>, %arg9: memref<8x8x128xf32, #tpu.memory_space<vmem>>, %arg10: memref<8x8x512xf32, #tpu.memory_space<vmem>>) attributes {dimension_semantics = [#tpu.dimension_semantics<parallel>, #tpu.dimension_semantics<arbitrary>], iteration_bounds = array<i64: 1, 2>, scalar_prefetch = 0 : i64, scratch_operands = 2 : i64, tpu.core_type = #tpu.core_type<tc>, window_params = [{transform_indices = @transform_0, window_bounds = array<i64: 8, 8, 128>}, {transform_indices = @transform_1, window_bounds = array<i64: 1, 128, 512>}, {transform_indices = @transform_2, window_bounds = array<i64: 1, 128, 512>}, {transform_indices = @transform_3, window_bounds = array<i64: 1, 1, 512>}, {pipeline_mode = #tpu.pipeline_mode<synchronous>, transform_indices = @transform_4, window_bounds = array<i64: 128, 128>}, {pipeline_mode = #tpu.pipeline_mode<synchronous>, transform_indices = @transform_5, window_bounds = array<i64: 1, 128>}, {transform_indices = @transform_6, window_bounds = array<i64: 8, 128>}]} {
    %c0 = arith.constant 0 : index
    %c0_0 = arith.constant 0 : index
    %c0_1 = arith.constant 0 : index
    %0 = vector.load %arg3[%c0, %c0_0, %c0_1] : memref<1x128x512xbf16, #tpu.memory_space<vmem>>, vector<1x128x512xbf16>
    %1 = vector.shape_cast %0 : vector<1x128x512xbf16> to vector<128x512xbf16>
    %c0_2 = arith.constant 0 : index
    %c0_3 = arith.constant 0 : index
    %c0_4 = arith.constant 0 : index
    %2 = vector.load %arg4[%c0_2, %c0_3, %c0_4] : memref<1x128x512xbf16, #tpu.memory_space<vmem>>, vector<1x128x512xbf16>
    %3 = vector.shape_cast %2 : vector<1x128x512xbf16> to vector<128x512xbf16>
    %c0_5 = arith.constant 0 : index
    %c0_6 = arith.constant 0 : index
    %c0_7 = arith.constant 0 : index
    %4 = vector.load %arg5[%c0_5, %c0_6, %c0_7] : memref<1x1x512xf32, #tpu.memory_space<vmem>>, vector<1x1x512xf32>
    %5 = vector.shape_cast %4 : vector<1x1x512xf32> to vector<1x512xf32>
    %c0_i32 = arith.constant 0 : i32
    %6 = arith.cmpi eq, %arg1, %c0_i32 : i32
    %7 = arith.extui %6 : i1 to i32
    %c0_i32_8 = arith.constant 0 : i32
    %8 = arith.cmpi ne, %7, %c0_i32_8 : i32
    scf.if %8 {
      %c0_84 = arith.constant 0 : index
      %c0_85 = arith.constant 0 : index
      %c0_86 = arith.constant 0 : index
      %295 = vector.load %arg2[%c0_84, %c0_85, %c0_86] : memref<8x8x128xf32, #tpu.memory_space<vmem>>, vector<8x8x128xf32>
      %c0_87 = arith.constant 0 : index
      %c0_88 = arith.constant 0 : index
      %c0_89 = arith.constant 0 : index
      %296 = vector.load %arg9[%c0_87, %c0_88, %c0_89] : memref<8x8x128xf32, #tpu.memory_space<vmem>>, vector<8x8x128xf32>
      tpu.vector_store %arg9[%c0_87, %c0_88, %c0_89], %295 {strides = array<i32>} : memref<8x8x128xf32, #tpu.memory_space<vmem>>, vector<8x8x128xf32>,
    } else {
    }
    %c0_9 = arith.constant 0 : index
    %c0_10 = arith.constant 0 : index
    %c0_11 = arith.constant 0 : index
    %9 = vector.load %arg9[%c0_9, %c0_10, %c0_11] : memref<8x8x128xf32, #tpu.memory_space<vmem>>, vector<8x8x128xf32>
    %10 = vector.shape_cast %9 : vector<8x8x128xf32> to vector<64x128xf32>
    %11 = arith.truncf %10 : vector<64x128xf32> to vector<64x128xbf16>
    %cst = arith.constant dense<0.000000e+00> : vector<64x512xf32>
    %12 = tpu.matmul %11, %1, %cst {dimension_numbers = #tpu.dot_dimension_numbers<[1], [0], [0], [1], [0, 0, 1, 1], [], []>} : vector<64x128xbf16>, vector<128x512xbf16>, vector<64x512xf32> -> vector<64x512xf32>
    %13 = vector.shape_cast %12 : vector<64x512xf32> to vector<8x8x512xf32>
    %14 = vector.shape_cast %5 : vector<1x512xf32> to vector<1x1x512xf32>
    %15 = vector.broadcast %14 : vector<1x1x512xf32> to vector<8x8x512xf32>
    %16 = arith.addf %13, %15 : vector<8x8x512xf32>
    %c0_12 = arith.constant 0 : index
    %c0_13 = arith.constant 0 : index
    %c0_14 = arith.constant 0 : index
    %17 = vector.load %arg10[%c0_12, %c0_13, %c0_14] : memref<8x8x512xf32, #tpu.memory_space<vmem>>, vector<8x8x512xf32>
    tpu.vector_store %arg10[%c0_12, %c0_13, %c0_14], %16 {strides = array<i32>} : memref<8x8x512xf32, #tpu.memory_space<vmem>>, vector<8x8x512xf32>,
    %cst_15 = arith.constant 0.000000e+00 : f32
    %18 = vector.broadcast %cst_15 : f32 to vector<8x128xf32>
    %cst_16 = arith.constant 0.000000e+00 : f32
    %19 = vector.broadcast %cst_16 : f32 to vector<8x128xf32>
    %c0_i32_17 = arith.constant 0 : i32
    %20 = arith.index_cast %c0_i32_17 : i32 to index
    %c0_18 = arith.constant 0 : index
    %c0_19 = arith.constant 0 : index
    %21 = vector.load %arg10[%20, %c0_18, %c0_19] : memref<8x8x512xf32, #tpu.memory_space<vmem>>, vector<1x8x512xf32>
    %22 = vector.shape_cast %21 : vector<1x8x512xf32> to vector<8x512xf32>
    %23 = arith.truncf %18 : vector<8x128xf32> to vector<8x128xbf16>
    %cst_20 = arith.constant dense<0.000000e+00> : vector<8x512xf32>
    %24 = tpu.matmul %23, %3, %cst_20 {dimension_numbers = #tpu.dot_dimension_numbers<[1], [0], [0], [1], [0, 0, 1, 1], [], []>} : vector<8x128xbf16>, vector<128x512xbf16>, vector<8x512xf32> -> vector<8x512xf32>
    %25 = arith.addf %22, %24 : vector<8x512xf32>
    %26 = vector.extract_strided_slice %25 {offsets = [0, 0], sizes = [8, 128], strides = [1, 1]} : vector<8x512xf32> to vector<8x128xf32>
    %27 = arith.negf %26 : vector<8x128xf32>
    %28 = math.exp %27 : vector<8x128xf32>
    %cst_21 = arith.constant 1.000000e+00 : f32
    %29 = vector.broadcast %cst_21 : f32 to vector<8x128xf32>
    %30 = arith.addf %29, %28 : vector<8x128xf32>
    %31 = arith.divf %29, %30 : vector<8x128xf32>
    %32 = vector.extract_strided_slice %25 {offsets = [0, 128], sizes = [8, 128], strides = [1, 1]} : vector<8x512xf32> to vector<8x128xf32>
    %33 = arith.negf %32 : vector<8x128xf32>
    %34 = math.exp %33 : vector<8x128xf32>
    %cst_22 = arith.constant 1.000000e+00 : f32
    %35 = vector.broadcast %cst_22 : f32 to vector<8x128xf32>
    %36 = arith.addf %35, %34 : vector<8x128xf32>
    %37 = arith.divf %35, %36 : vector<8x128xf32>
    %38 = vector.extract_strided_slice %25 {offsets = [0, 256], sizes = [8, 128], strides = [1, 1]} : vector<8x512xf32> to vector<8x128xf32>
    %39 = math.tanh %38 : vector<8x128xf32>
    %40 = vector.extract_strided_slice %25 {offsets = [0, 384], sizes = [8, 128], strides = [1, 1]} : vector<8x512xf32> to vector<8x128xf32>
    %41 = arith.negf %40 : vector<8x128xf32>
    %42 = math.exp %41 : vector<8x128xf32>
    %cst_23 = arith.constant 1.000000e+00 : f32
    %43 = vector.broadcast %cst_23 : f32 to vector<8x128xf32>
    %44 = arith.addf %43, %42 : vector<8x128xf32>
    %45 = arith.divf %43, %44 : vector<8x128xf32>
    %46 = arith.mulf %37, %19 : vector<8x128xf32>
    %47 = arith.mulf %31, %39 : vector<8x128xf32>
    %48 = arith.addf %46, %47 : vector<8x128xf32>
    %49 = math.tanh %48 : vector<8x128xf32>
    %50 = arith.mulf %45, %49 : vector<8x128xf32>
    %c1_i32 = arith.constant 1 : i32
    %51 = arith.cmpi slt, %arg1, %c1_i32 : i32
    %52 = arith.extui %51 : i1 to i32
    %c0_i32_24 = arith.constant 0 : i32
    %53 = arith.cmpi ne, %52, %c0_i32_24 : i32
    scf.if %53 {
      %295 = arith.index_cast %c0_i32_17 : i32 to index
      %c0_84 = arith.constant 0 : index
      %c0_85 = arith.constant 0 : index
      %296 = vector.load %arg9[%295, %c0_84, %c0_85] : memref<8x8x128xf32, #tpu.memory_space<vmem>>, vector<1x8x128xf32>
      %297 = vector.shape_cast %296 : vector<1x8x128xf32> to vector<8x128xf32>
      %298 = vector.shape_cast %50 : vector<8x128xf32> to vector<1x8x128xf32>
      tpu.vector_store %arg9[%295, %c0_84, %c0_85], %298 {strides = array<i32>} : memref<8x8x128xf32, #tpu.memory_space<vmem>>, vector<1x8x128xf32>,
    } else {
    }
    %c1_i32_25 = arith.constant 1 : i32
    %54 = arith.index_cast %c1_i32_25 : i32 to index
    %c0_26 = arith.constant 0 : index
    %c0_27 = arith.constant 0 : index
    %55 = vector.load %arg10[%54, %c0_26, %c0_27] : memref<8x8x512xf32, #tpu.memory_space<vmem>>, vector<1x8x512xf32>
    %56 = vector.shape_cast %55 : vector<1x8x512xf32> to vector<8x512xf32>
    %57 = arith.truncf %50 : vector<8x128xf32> to vector<8x128xbf16>
    %cst_28 = arith.constant dense<0.000000e+00> : vector<8x512xf32>
    %58 = tpu.matmul %57, %3, %cst_28 {dimension_numbers = #tpu.dot_dimension_numbers<[1], [0], [0], [1], [0, 0, 1, 1], [], []>} : vector<8x128xbf16>, vector<128x512xbf16>, vector<8x512xf32> -> vector<8x512xf32>
    %59 = arith.addf %56, %58 : vector<8x512xf32>
    %60 = vector.extract_strided_slice %59 {offsets = [0, 0], sizes = [8, 128], strides = [1, 1]} : vector<8x512xf32> to vector<8x128xf32>
    %61 = arith.negf %60 : vector<8x128xf32>
    %62 = math.exp %61 : vector<8x128xf32>
    %cst_29 = arith.constant 1.000000e+00 : f32
    %63 = vector.broadcast %cst_29 : f32 to vector<8x128xf32>
    %64 = arith.addf %63, %62 : vector<8x128xf32>
    %65 = arith.divf %63, %64 : vector<8x128xf32>
    %66 = vector.extract_strided_slice %59 {offsets = [0, 128], sizes = [8, 128], strides = [1, 1]} : vector<8x512xf32> to vector<8x128xf32>
    %67 = arith.negf %66 : vector<8x128xf32>
    %68 = math.exp %67 : vector<8x128xf32>
    %cst_30 = arith.constant 1.000000e+00 : f32
    %69 = vector.broadcast %cst_30 : f32 to vector<8x128xf32>
    %70 = arith.addf %69, %68 : vector<8x128xf32>
    %71 = arith.divf %69, %70 : vector<8x128xf32>
    %72 = vector.extract_strided_slice %59 {offsets = [0, 256], sizes = [8, 128], strides = [1, 1]} : vector<8x512xf32> to vector<8x128xf32>
    %73 = math.tanh %72 : vector<8x128xf32>
    %74 = vector.extract_strided_slice %59 {offsets = [0, 384], sizes = [8, 128], strides = [1, 1]} : vector<8x512xf32> to vector<8x128xf32>
    %75 = arith.negf %74 : vector<8x128xf32>
    %76 = math.exp %75 : vector<8x128xf32>
    %cst_31 = arith.constant 1.000000e+00 : f32
    %77 = vector.broadcast %cst_31 : f32 to vector<8x128xf32>
    %78 = arith.addf %77, %76 : vector<8x128xf32>
    %79 = arith.divf %77, %78 : vector<8x128xf32>
    %80 = arith.mulf %71, %48 : vector<8x128xf32>
    %81 = arith.mulf %65, %73 : vector<8x128xf32>
    %82 = arith.addf %80, %81 : vector<8x128xf32>
    %83 = math.tanh %82 : vector<8x128xf32>
    %84 = arith.mulf %79, %83 : vector<8x128xf32>
    %c1_i32_32 = arith.constant 1 : i32
    %85 = arith.cmpi slt, %arg1, %c1_i32_32 : i32
    %86 = arith.extui %85 : i1 to i32
    %c0_i32_33 = arith.constant 0 : i32
    %87 = arith.cmpi ne, %86, %c0_i32_33 : i32
    scf.if %87 {
      %295 = arith.index_cast %c1_i32_25 : i32 to index
      %c0_84 = arith.constant 0 : index
      %c0_85 = arith.constant 0 : index
      %296 = vector.load %arg9[%295, %c0_84, %c0_85] : memref<8x8x128xf32, #tpu.memory_space<vmem>>, vector<1x8x128xf32>
      %297 = vector.shape_cast %296 : vector<1x8x128xf32> to vector<8x128xf32>
      %298 = vector.shape_cast %84 : vector<8x128xf32> to vector<1x8x128xf32>
      tpu.vector_store %arg9[%295, %c0_84, %c0_85], %298 {strides = array<i32>} : memref<8x8x128xf32, #tpu.memory_space<vmem>>, vector<1x8x128xf32>,
    } else {
    }
    %c2_i32 = arith.constant 2 : i32
    %88 = arith.index_cast %c2_i32 : i32 to index
    %c0_34 = arith.constant 0 : index
    %c0_35 = arith.constant 0 : index
    %89 = vector.load %arg10[%88, %c0_34, %c0_35] : memref<8x8x512xf32, #tpu.memory_space<vmem>>, vector<1x8x512xf32>
    %90 = vector.shape_cast %89 : vector<1x8x512xf32> to vector<8x512xf32>
    %91 = arith.truncf %84 : vector<8x128xf32> to vector<8x128xbf16>
    %cst_36 = arith.constant dense<0.000000e+00> : vector<8x512xf32>
    %92 = tpu.matmul %91, %3, %cst_36 {dimension_numbers = #tpu.dot_dimension_numbers<[1], [0], [0], [1], [0, 0, 1, 1], [], []>} : vector<8x128xbf16>, vector<128x512xbf16>, vector<8x512xf32> -> vector<8x512xf32>
    %93 = arith.addf %90, %92 : vector<8x512xf32>
    %94 = vector.extract_strided_slice %93 {offsets = [0, 0], sizes = [8, 128], strides = [1, 1]} : vector<8x512xf32> to vector<8x128xf32>
    %95 = arith.negf %94 : vector<8x128xf32>
    %96 = math.exp %95 : vector<8x128xf32>
    %cst_37 = arith.constant 1.000000e+00 : f32
    %97 = vector.broadcast %cst_37 : f32 to vector<8x128xf32>
    %98 = arith.addf %97, %96 : vector<8x128xf32>
    %99 = arith.divf %97, %98 : vector<8x128xf32>
    %100 = vector.extract_strided_slice %93 {offsets = [0, 128], sizes = [8, 128], strides = [1, 1]} : vector<8x512xf32> to vector<8x128xf32>
    %101 = arith.negf %100 : vector<8x128xf32>
    %102 = math.exp %101 : vector<8x128xf32>
    %cst_38 = arith.constant 1.000000e+00 : f32
    %103 = vector.broadcast %cst_38 : f32 to vector<8x128xf32>
    %104 = arith.addf %103, %102 : vector<8x128xf32>
    %105 = arith.divf %103, %104 : vector<8x128xf32>
    %106 = vector.extract_strided_slice %93 {offsets = [0, 256], sizes = [8, 128], strides = [1, 1]} : vector<8x512xf32> to vector<8x128xf32>
    %107 = math.tanh %106 : vector<8x128xf32>
    %108 = vector.extract_strided_slice %93 {offsets = [0, 384], sizes = [8, 128], strides = [1, 1]} : vector<8x512xf32> to vector<8x128xf32>
    %109 = arith.negf %108 : vector<8x128xf32>
    %110 = math.exp %109 : vector<8x128xf32>
    %cst_39 = arith.constant 1.000000e+00 : f32
    %111 = vector.broadcast %cst_39 : f32 to vector<8x128xf32>
    %112 = arith.addf %111, %110 : vector<8x128xf32>
    %113 = arith.divf %111, %112 : vector<8x128xf32>
    %114 = arith.mulf %105, %82 : vector<8x128xf32>
    %115 = arith.mulf %99, %107 : vector<8x128xf32>
    %116 = arith.addf %114, %115 : vector<8x128xf32>
    %117 = math.tanh %116 : vector<8x128xf32>
    %118 = arith.mulf %113, %117 : vector<8x128xf32>
    %c1_i32_40 = arith.constant 1 : i32
    %119 = arith.cmpi slt, %arg1, %c1_i32_40 : i32
    %120 = arith.extui %119 : i1 to i32
    %c0_i32_41 = arith.constant 0 : i32
    %121 = arith.cmpi ne, %120, %c0_i32_41 : i32
    scf.if %121 {
      %295 = arith.index_cast %c2_i32 : i32 to index
      %c0_84 = arith.constant 0 : index
      %c0_85 = arith.constant 0 : index
      %296 = vector.load %arg9[%295, %c0_84, %c0_85] : memref<8x8x128xf32, #tpu.memory_space<vmem>>, vector<1x8x128xf32>
      %297 = vector.shape_cast %296 : vector<1x8x128xf32> to vector<8x128xf32>
      %298 = vector.shape_cast %118 : vector<8x128xf32> to vector<1x8x128xf32>
      tpu.vector_store %arg9[%295, %c0_84, %c0_85], %298 {strides = array<i32>} : memref<8x8x128xf32, #tpu.memory_space<vmem>>, vector<1x8x128xf32>,
    } else {
    }
    %c3_i32 = arith.constant 3 : i32
    %122 = arith.index_cast %c3_i32 : i32 to index
    %c0_42 = arith.constant 0 : index
    %c0_43 = arith.constant 0 : index
    %123 = vector.load %arg10[%122, %c0_42, %c0_43] : memref<8x8x512xf32, #tpu.memory_space<vmem>>, vector<1x8x512xf32>
    %124 = vector.shape_cast %123 : vector<1x8x512xf32> to vector<8x512xf32>
    %125 = arith.truncf %118 : vector<8x128xf32> to vector<8x128xbf16>
    %cst_44 = arith.constant dense<0.000000e+00> : vector<8x512xf32>
    %126 = tpu.matmul %125, %3, %cst_44 {dimension_numbers = #tpu.dot_dimension_numbers<[1], [0], [0], [1], [0, 0, 1, 1], [], []>} : vector<8x128xbf16>, vector<128x512xbf16>, vector<8x512xf32> -> vector<8x512xf32>
    %127 = arith.addf %124, %126 : vector<8x512xf32>
    %128 = vector.extract_strided_slice %127 {offsets = [0, 0], sizes = [8, 128], strides = [1, 1]} : vector<8x512xf32> to vector<8x128xf32>
    %129 = arith.negf %128 : vector<8x128xf32>
    %130 = math.exp %129 : vector<8x128xf32>
    %cst_45 = arith.constant 1.000000e+00 : f32
    %131 = vector.broadcast %cst_45 : f32 to vector<8x128xf32>
    %132 = arith.addf %131, %130 : vector<8x128xf32>
    %133 = arith.divf %131, %132 : vector<8x128xf32>
    %134 = vector.extract_strided_slice %127 {offsets = [0, 128], sizes = [8, 128], strides = [1, 1]} : vector<8x512xf32> to vector<8x128xf32>
    %135 = arith.negf %134 : vector<8x128xf32>
    %136 = math.exp %135 : vector<8x128xf32>
    %cst_46 = arith.constant 1.000000e+00 : f32
    %137 = vector.broadcast %cst_46 : f32 to vector<8x128xf32>
    %138 = arith.addf %137, %136 : vector<8x128xf32>
    %139 = arith.divf %137, %138 : vector<8x128xf32>
    %140 = vector.extract_strided_slice %127 {offsets = [0, 256], sizes = [8, 128], strides = [1, 1]} : vector<8x512xf32> to vector<8x128xf32>
    %141 = math.tanh %140 : vector<8x128xf32>
    %142 = vector.extract_strided_slice %127 {offsets = [0, 384], sizes = [8, 128], strides = [1, 1]} : vector<8x512xf32> to vector<8x128xf32>
    %143 = arith.negf %142 : vector<8x128xf32>
    %144 = math.exp %143 : vector<8x128xf32>
    %cst_47 = arith.constant 1.000000e+00 : f32
    %145 = vector.broadcast %cst_47 : f32 to vector<8x128xf32>
    %146 = arith.addf %145, %144 : vector<8x128xf32>
    %147 = arith.divf %145, %146 : vector<8x128xf32>
    %148 = arith.mulf %139, %116 : vector<8x128xf32>
    %149 = arith.mulf %133, %141 : vector<8x128xf32>
    %150 = arith.addf %148, %149 : vector<8x128xf32>
    %151 = math.tanh %150 : vector<8x128xf32>
    %152 = arith.mulf %147, %151 : vector<8x128xf32>
    %c1_i32_48 = arith.constant 1 : i32
    %153 = arith.cmpi slt, %arg1, %c1_i32_48 : i32
    %154 = arith.extui %153 : i1 to i32
    %c0_i32_49 = arith.constant 0 : i32
    %155 = arith.cmpi ne, %154, %c0_i32_49 : i32
    scf.if %155 {
      %295 = arith.index_cast %c3_i32 : i32 to index
      %c0_84 = arith.constant 0 : index
      %c0_85 = arith.constant 0 : index
      %296 = vector.load %arg9[%295, %c0_84, %c0_85] : memref<8x8x128xf32, #tpu.memory_space<vmem>>, vector<1x8x128xf32>
      %297 = vector.shape_cast %296 : vector<1x8x128xf32> to vector<8x128xf32>
      %298 = vector.shape_cast %152 : vector<8x128xf32> to vector<1x8x128xf32>
      tpu.vector_store %arg9[%295, %c0_84, %c0_85], %298 {strides = array<i32>} : memref<8x8x128xf32, #tpu.memory_space<vmem>>, vector<1x8x128xf32>,
    } else {
    }
    %c4_i32 = arith.constant 4 : i32
    %156 = arith.index_cast %c4_i32 : i32 to index
    %c0_50 = arith.constant 0 : index
    %c0_51 = arith.constant 0 : index
    %157 = vector.load %arg10[%156, %c0_50, %c0_51] : memref<8x8x512xf32, #tpu.memory_space<vmem>>, vector<1x8x512xf32>
    %158 = vector.shape_cast %157 : vector<1x8x512xf32> to vector<8x512xf32>
    %159 = arith.truncf %152 : vector<8x128xf32> to vector<8x128xbf16>
    %cst_52 = arith.constant dense<0.000000e+00> : vector<8x512xf32>
    %160 = tpu.matmul %159, %3, %cst_52 {dimension_numbers = #tpu.dot_dimension_numbers<[1], [0], [0], [1], [0, 0, 1, 1], [], []>} : vector<8x128xbf16>, vector<128x512xbf16>, vector<8x512xf32> -> vector<8x512xf32>
    %161 = arith.addf %158, %160 : vector<8x512xf32>
    %162 = vector.extract_strided_slice %161 {offsets = [0, 0], sizes = [8, 128], strides = [1, 1]} : vector<8x512xf32> to vector<8x128xf32>
    %163 = arith.negf %162 : vector<8x128xf32>
    %164 = math.exp %163 : vector<8x128xf32>
    %cst_53 = arith.constant 1.000000e+00 : f32
    %165 = vector.broadcast %cst_53 : f32 to vector<8x128xf32>
    %166 = arith.addf %165, %164 : vector<8x128xf32>
    %167 = arith.divf %165, %166 : vector<8x128xf32>
    %168 = vector.extract_strided_slice %161 {offsets = [0, 128], sizes = [8, 128], strides = [1, 1]} : vector<8x512xf32> to vector<8x128xf32>
    %169 = arith.negf %168 : vector<8x128xf32>
    %170 = math.exp %169 : vector<8x128xf32>
    %cst_54 = arith.constant 1.000000e+00 : f32
    %171 = vector.broadcast %cst_54 : f32 to vector<8x128xf32>
    %172 = arith.addf %171, %170 : vector<8x128xf32>
    %173 = arith.divf %171, %172 : vector<8x128xf32>
    %174 = vector.extract_strided_slice %161 {offsets = [0, 256], sizes = [8, 128], strides = [1, 1]} : vector<8x512xf32> to vector<8x128xf32>
    %175 = math.tanh %174 : vector<8x128xf32>
    %176 = vector.extract_strided_slice %161 {offsets = [0, 384], sizes = [8, 128], strides = [1, 1]} : vector<8x512xf32> to vector<8x128xf32>
    %177 = arith.negf %176 : vector<8x128xf32>
    %178 = math.exp %177 : vector<8x128xf32>
    %cst_55 = arith.constant 1.000000e+00 : f32
    %179 = vector.broadcast %cst_55 : f32 to vector<8x128xf32>
    %180 = arith.addf %179, %178 : vector<8x128xf32>
    %181 = arith.divf %179, %180 : vector<8x128xf32>
    %182 = arith.mulf %173, %150 : vector<8x128xf32>
    %183 = arith.mulf %167, %175 : vector<8x128xf32>
    %184 = arith.addf %182, %183 : vector<8x128xf32>
    %185 = math.tanh %184 : vector<8x128xf32>
    %186 = arith.mulf %181, %185 : vector<8x128xf32>
    %c1_i32_56 = arith.constant 1 : i32
    %187 = arith.cmpi slt, %arg1, %c1_i32_56 : i32
    %188 = arith.extui %187 : i1 to i32
    %c0_i32_57 = arith.constant 0 : i32
    %189 = arith.cmpi ne, %188, %c0_i32_57 : i32
    scf.if %189 {
      %295 = arith.index_cast %c4_i32 : i32 to index
      %c0_84 = arith.constant 0 : index
      %c0_85 = arith.constant 0 : index
      %296 = vector.load %arg9[%295, %c0_84, %c0_85] : memref<8x8x128xf32, #tpu.memory_space<vmem>>, vector<1x8x128xf32>
      %297 = vector.shape_cast %296 : vector<1x8x128xf32> to vector<8x128xf32>
      %298 = vector.shape_cast %186 : vector<8x128xf32> to vector<1x8x128xf32>
      tpu.vector_store %arg9[%295, %c0_84, %c0_85], %298 {strides = array<i32>} : memref<8x8x128xf32, #tpu.memory_space<vmem>>, vector<1x8x128xf32>,
    } else {
    }
    %c5_i32 = arith.constant 5 : i32
    %190 = arith.index_cast %c5_i32 : i32 to index
    %c0_58 = arith.constant 0 : index
    %c0_59 = arith.constant 0 : index
    %191 = vector.load %arg10[%190, %c0_58, %c0_59] : memref<8x8x512xf32, #tpu.memory_space<vmem>>, vector<1x8x512xf32>
    %192 = vector.shape_cast %191 : vector<1x8x512xf32> to vector<8x512xf32>
    %193 = arith.truncf %186 : vector<8x128xf32> to vector<8x128xbf16>
    %cst_60 = arith.constant dense<0.000000e+00> : vector<8x512xf32>
    %194 = tpu.matmul %193, %3, %cst_60 {dimension_numbers = #tpu.dot_dimension_numbers<[1], [0], [0], [1], [0, 0, 1, 1], [], []>} : vector<8x128xbf16>, vector<128x512xbf16>, vector<8x512xf32> -> vector<8x512xf32>
    %195 = arith.addf %192, %194 : vector<8x512xf32>
    %196 = vector.extract_strided_slice %195 {offsets = [0, 0], sizes = [8, 128], strides = [1, 1]} : vector<8x512xf32> to vector<8x128xf32>
    %197 = arith.negf %196 : vector<8x128xf32>
    %198 = math.exp %197 : vector<8x128xf32>
    %cst_61 = arith.constant 1.000000e+00 : f32
    %199 = vector.broadcast %cst_61 : f32 to vector<8x128xf32>
    %200 = arith.addf %199, %198 : vector<8x128xf32>
    %201 = arith.divf %199, %200 : vector<8x128xf32>
    %202 = vector.extract_strided_slice %195 {offsets = [0, 128], sizes = [8, 128], strides = [1, 1]} : vector<8x512xf32> to vector<8x128xf32>
    %203 = arith.negf %202 : vector<8x128xf32>
    %204 = math.exp %203 : vector<8x128xf32>
    %cst_62 = arith.constant 1.000000e+00 : f32
    %205 = vector.broadcast %cst_62 : f32 to vector<8x128xf32>
    %206 = arith.addf %205, %204 : vector<8x128xf32>
    %207 = arith.divf %205, %206 : vector<8x128xf32>
    %208 = vector.extract_strided_slice %195 {offsets = [0, 256], sizes = [8, 128], strides = [1, 1]} : vector<8x512xf32> to vector<8x128xf32>
    %209 = math.tanh %208 : vector<8x128xf32>
    %210 = vector.extract_strided_slice %195 {offsets = [0, 384], sizes = [8, 128], strides = [1, 1]} : vector<8x512xf32> to vector<8x128xf32>
    %211 = arith.negf %210 : vector<8x128xf32>
    %212 = math.exp %211 : vector<8x128xf32>
    %cst_63 = arith.constant 1.000000e+00 : f32
    %213 = vector.broadcast %cst_63 : f32 to vector<8x128xf32>
    %214 = arith.addf %213, %212 : vector<8x128xf32>
    %215 = arith.divf %213, %214 : vector<8x128xf32>
    %216 = arith.mulf %207, %184 : vector<8x128xf32>
    %217 = arith.mulf %201, %209 : vector<8x128xf32>
    %218 = arith.addf %216, %217 : vector<8x128xf32>
    %219 = math.tanh %218 : vector<8x128xf32>
    %220 = arith.mulf %215, %219 : vector<8x128xf32>
    %c1_i32_64 = arith.constant 1 : i32
    %221 = arith.cmpi slt, %arg1, %c1_i32_64 : i32
    %222 = arith.extui %221 : i1 to i32
    %c0_i32_65 = arith.constant 0 : i32
    %223 = arith.cmpi ne, %222, %c0_i32_65 : i32
    scf.if %223 {
      %295 = arith.index_cast %c5_i32 : i32 to index
      %c0_84 = arith.constant 0 : index
      %c0_85 = arith.constant 0 : index
      %296 = vector.load %arg9[%295, %c0_84, %c0_85] : memref<8x8x128xf32, #tpu.memory_space<vmem>>, vector<1x8x128xf32>
      %297 = vector.shape_cast %296 : vector<1x8x128xf32> to vector<8x128xf32>
      %298 = vector.shape_cast %220 : vector<8x128xf32> to vector<1x8x128xf32>
      tpu.vector_store %arg9[%295, %c0_84, %c0_85], %298 {strides = array<i32>} : memref<8x8x128xf32, #tpu.memory_space<vmem>>, vector<1x8x128xf32>,
    } else {
    }
    %c6_i32 = arith.constant 6 : i32
    %224 = arith.index_cast %c6_i32 : i32 to index
    %c0_66 = arith.constant 0 : index
    %c0_67 = arith.constant 0 : index
    %225 = vector.load %arg10[%224, %c0_66, %c0_67] : memref<8x8x512xf32, #tpu.memory_space<vmem>>, vector<1x8x512xf32>
    %226 = vector.shape_cast %225 : vector<1x8x512xf32> to vector<8x512xf32>
    %227 = arith.truncf %220 : vector<8x128xf32> to vector<8x128xbf16>
    %cst_68 = arith.constant dense<0.000000e+00> : vector<8x512xf32>
    %228 = tpu.matmul %227, %3, %cst_68 {dimension_numbers = #tpu.dot_dimension_numbers<[1], [0], [0], [1], [0, 0, 1, 1], [], []>} : vector<8x128xbf16>, vector<128x512xbf16>, vector<8x512xf32> -> vector<8x512xf32>
    %229 = arith.addf %226, %228 : vector<8x512xf32>
    %230 = vector.extract_strided_slice %229 {offsets = [0, 0], sizes = [8, 128], strides = [1, 1]} : vector<8x512xf32> to vector<8x128xf32>
    %231 = arith.negf %230 : vector<8x128xf32>
    %232 = math.exp %231 : vector<8x128xf32>
    %cst_69 = arith.constant 1.000000e+00 : f32
    %233 = vector.broadcast %cst_69 : f32 to vector<8x128xf32>
    %234 = arith.addf %233, %232 : vector<8x128xf32>
    %235 = arith.divf %233, %234 : vector<8x128xf32>
    %236 = vector.extract_strided_slice %229 {offsets = [0, 128], sizes = [8, 128], strides = [1, 1]} : vector<8x512xf32> to vector<8x128xf32>
    %237 = arith.negf %236 : vector<8x128xf32>
    %238 = math.exp %237 : vector<8x128xf32>
    %cst_70 = arith.constant 1.000000e+00 : f32
    %239 = vector.broadcast %cst_70 : f32 to vector<8x128xf32>
    %240 = arith.addf %239, %238 : vector<8x128xf32>
    %241 = arith.divf %239, %240 : vector<8x128xf32>
    %242 = vector.extract_strided_slice %229 {offsets = [0, 256], sizes = [8, 128], strides = [1, 1]} : vector<8x512xf32> to vector<8x128xf32>
    %243 = math.tanh %242 : vector<8x128xf32>
    %244 = vector.extract_strided_slice %229 {offsets = [0, 384], sizes = [8, 128], strides = [1, 1]} : vector<8x512xf32> to vector<8x128xf32>
    %245 = arith.negf %244 : vector<8x128xf32>
    %246 = math.exp %245 : vector<8x128xf32>
    %cst_71 = arith.constant 1.000000e+00 : f32
    %247 = vector.broadcast %cst_71 : f32 to vector<8x128xf32>
    %248 = arith.addf %247, %246 : vector<8x128xf32>
    %249 = arith.divf %247, %248 : vector<8x128xf32>
    %250 = arith.mulf %241, %218 : vector<8x128xf32>
    %251 = arith.mulf %235, %243 : vector<8x128xf32>
    %252 = arith.addf %250, %251 : vector<8x128xf32>
    %253 = math.tanh %252 : vector<8x128xf32>
    %254 = arith.mulf %249, %253 : vector<8x128xf32>
    %c1_i32_72 = arith.constant 1 : i32
    %255 = arith.cmpi slt, %arg1, %c1_i32_72 : i32
    %256 = arith.extui %255 : i1 to i32
    %c0_i32_73 = arith.constant 0 : i32
    %257 = arith.cmpi ne, %256, %c0_i32_73 : i32
    scf.if %257 {
      %295 = arith.index_cast %c6_i32 : i32 to index
      %c0_84 = arith.constant 0 : index
      %c0_85 = arith.constant 0 : index
      %296 = vector.load %arg9[%295, %c0_84, %c0_85] : memref<8x8x128xf32, #tpu.memory_space<vmem>>, vector<1x8x128xf32>
      %297 = vector.shape_cast %296 : vector<1x8x128xf32> to vector<8x128xf32>
      %298 = vector.shape_cast %254 : vector<8x128xf32> to vector<1x8x128xf32>
      tpu.vector_store %arg9[%295, %c0_84, %c0_85], %298 {strides = array<i32>} : memref<8x8x128xf32, #tpu.memory_space<vmem>>, vector<1x8x128xf32>,
    } else {
    }
    %c7_i32 = arith.constant 7 : i32
    %258 = arith.index_cast %c7_i32 : i32 to index
    %c0_74 = arith.constant 0 : index
    %c0_75 = arith.constant 0 : index
    %259 = vector.load %arg10[%258, %c0_74, %c0_75] : memref<8x8x512xf32, #tpu.memory_space<vmem>>, vector<1x8x512xf32>
    %260 = vector.shape_cast %259 : vector<1x8x512xf32> to vector<8x512xf32>
    %261 = arith.truncf %254 : vector<8x128xf32> to vector<8x128xbf16>
    %cst_76 = arith.constant dense<0.000000e+00> : vector<8x512xf32>
    %262 = tpu.matmul %261, %3, %cst_76 {dimension_numbers = #tpu.dot_dimension_numbers<[1], [0], [0], [1], [0, 0, 1, 1], [], []>} : vector<8x128xbf16>, vector<128x512xbf16>, vector<8x512xf32> -> vector<8x512xf32>
    %263 = arith.addf %260, %262 : vector<8x512xf32>
    %264 = vector.extract_strided_slice %263 {offsets = [0, 0], sizes = [8, 128], strides = [1, 1]} : vector<8x512xf32> to vector<8x128xf32>
    %265 = arith.negf %264 : vector<8x128xf32>
    %266 = math.exp %265 : vector<8x128xf32>
    %cst_77 = arith.constant 1.000000e+00 : f32
    %267 = vector.broadcast %cst_77 : f32 to vector<8x128xf32>
    %268 = arith.addf %267, %266 : vector<8x128xf32>
    %269 = arith.divf %267, %268 : vector<8x128xf32>
    %270 = vector.extract_strided_slice %263 {offsets = [0, 128], sizes = [8, 128], strides = [1, 1]} : vector<8x512xf32> to vector<8x128xf32>
    %271 = arith.negf %270 : vector<8x128xf32>
    %272 = math.exp %271 : vector<8x128xf32>
    %cst_78 = arith.constant 1.000000e+00 : f32
    %273 = vector.broadcast %cst_78 : f32 to vector<8x128xf32>
    %274 = arith.addf %273, %272 : vector<8x128xf32>
    %275 = arith.divf %273, %274 : vector<8x128xf32>
    %276 = vector.extract_strided_slice %263 {offsets = [0, 256], sizes = [8, 128], strides = [1, 1]} : vector<8x512xf32> to vector<8x128xf32>
    %277 = math.tanh %276 : vector<8x128xf32>
    %278 = vector.extract_strided_slice %263 {offsets = [0, 384], sizes = [8, 128], strides = [1, 1]} : vector<8x512xf32> to vector<8x128xf32>
    %279 = arith.negf %278 : vector<8x128xf32>
    %280 = math.exp %279 : vector<8x128xf32>
    %cst_79 = arith.constant 1.000000e+00 : f32
    %281 = vector.broadcast %cst_79 : f32 to vector<8x128xf32>
    %282 = arith.addf %281, %280 : vector<8x128xf32>
    %283 = arith.divf %281, %282 : vector<8x128xf32>
    %284 = arith.mulf %275, %252 : vector<8x128xf32>
    %285 = arith.mulf %269, %277 : vector<8x128xf32>
    %286 = arith.addf %284, %285 : vector<8x128xf32>
    %287 = math.tanh %286 : vector<8x128xf32>
    %288 = arith.mulf %283, %287 : vector<8x128xf32>
    %c1_i32_80 = arith.constant 1 : i32
    %289 = arith.cmpi slt, %arg1, %c1_i32_80 : i32
    %290 = arith.extui %289 : i1 to i32
    %c0_i32_81 = arith.constant 0 : i32
    %291 = arith.cmpi ne, %290, %c0_i32_81 : i32
    scf.if %291 {
      %295 = arith.index_cast %c7_i32 : i32 to index
      %c0_84 = arith.constant 0 : index
      %c0_85 = arith.constant 0 : index
      %296 = vector.load %arg9[%295, %c0_84, %c0_85] : memref<8x8x128xf32, #tpu.memory_space<vmem>>, vector<1x8x128xf32>
      %297 = vector.shape_cast %296 : vector<1x8x128xf32> to vector<8x128xf32>
      %298 = vector.shape_cast %288 : vector<8x128xf32> to vector<1x8x128xf32>
      tpu.vector_store %arg9[%295, %c0_84, %c0_85], %298 {strides = array<i32>} : memref<8x8x128xf32, #tpu.memory_space<vmem>>, vector<1x8x128xf32>,
    } else {
    }
    %c8_i32 = arith.constant 8 : i32
    %c1_i32_82 = arith.constant 1 : i32
    %292 = arith.cmpi eq, %arg1, %c1_i32_82 : i32
    %293 = arith.extui %292 : i1 to i32
    %c0_i32_83 = arith.constant 0 : i32
    %294 = arith.cmpi ne, %293, %c0_i32_83 : i32
    scf.if %294 {
      %295 = arith.truncf %288 : vector<8x128xf32> to vector<8x128xbf16>
      %c0_84 = arith.constant 0 : index
      %c0_85 = arith.constant 0 : index
      %296 = vector.load %arg6[%c0_84, %c0_85] : memref<128x128xbf16, #tpu.memory_space<vmem>>, vector<128x128xbf16>
      %cst_86 = arith.constant dense<0.000000e+00> : vector<8x128xf32>
      %297 = tpu.matmul %295, %296, %cst_86 {dimension_numbers = #tpu.dot_dimension_numbers<[1], [0], [0], [1], [0, 0, 1, 1], [], []>} : vector<8x128xbf16>, vector<128x128xbf16>, vector<8x128xf32> -> vector<8x128xf32>
      %c0_87 = arith.constant 0 : index
      %c0_88 = arith.constant 0 : index
      %298 = vector.load %arg7[%c0_87, %c0_88] : memref<1x128xf32, #tpu.memory_space<vmem>>, vector<1x128xf32>
      %299 = vector.broadcast %298 : vector<1x128xf32> to vector<8x128xf32>
      %300 = arith.addf %297, %299 : vector<8x128xf32>
      %301 = arith.negf %300 : vector<8x128xf32>
      %302 = math.exp %301 : vector<8x128xf32>
      %cst_89 = arith.constant 1.000000e+00 : f32
      %303 = vector.broadcast %cst_89 : f32 to vector<8x128xf32>
      %304 = arith.addf %303, %302 : vector<8x128xf32>
      %305 = arith.divf %303, %304 : vector<8x128xf32>
      %c0_90 = arith.constant 0 : index
      %c0_91 = arith.constant 0 : index
      %306 = vector.load %arg8[%c0_90, %c0_91] : memref<8x128xf32, #tpu.memory_space<vmem>>, vector<8x128xf32>
      tpu.vector_store %arg8[%c0_90, %c0_91], %305 {strides = array<i32>} : memref<8x128xf32, #tpu.memory_space<vmem>>, vector<8x128xf32>,
    } else {
    }
    return
  }
  func.func @transform_0(%arg0: i32, %arg1: i32) -> (i32, i32, i32) {
    %c0_i32 = arith.constant 0 : i32
    %c0_i32_0 = arith.constant 0 : i32
    %c0_i32_1 = arith.constant 0 : i32
    return %c0_i32, %arg0, %c0_i32_0 : i32, i32, i32
  }
  func.func @transform_1(%arg0: i32, %arg1: i32) -> (i32, i32, i32) {
    %c0_i32 = arith.constant 0 : i32
    %c0_i32_0 = arith.constant 0 : i32
    %c0_i32_1 = arith.constant 0 : i32
    return %arg1, %c0_i32, %c0_i32_0 : i32, i32, i32
  }
  func.func @transform_2(%arg0: i32, %arg1: i32) -> (i32, i32, i32) {
    %c0_i32 = arith.constant 0 : i32
    %c0_i32_0 = arith.constant 0 : i32
    %c0_i32_1 = arith.constant 0 : i32
    return %arg1, %c0_i32, %c0_i32_0 : i32, i32, i32
  }
  func.func @transform_3(%arg0: i32, %arg1: i32) -> (i32, i32, i32) {
    %c0_i32 = arith.constant 0 : i32
    %c0_i32_0 = arith.constant 0 : i32
    %c0_i32_1 = arith.constant 0 : i32
    return %arg1, %c0_i32, %c0_i32_0 : i32, i32, i32
  }
  func.func @transform_4(%arg0: i32, %arg1: i32) -> (i32, i32) {
    %c0_i32 = arith.constant 0 : i32
    %c0_i32_0 = arith.constant 0 : i32
    %c0_i32_1 = arith.constant 0 : i32
    return %c0_i32, %c0_i32_0 : i32, i32
  }
  func.func @transform_5(%arg0: i32, %arg1: i32) -> (i32, i32) {
    %c0_i32 = arith.constant 0 : i32
    %c0_i32_0 = arith.constant 0 : i32
    %c0_i32_1 = arith.constant 0 : i32
    return %c0_i32, %c0_i32_0 : i32, i32
  }
  func.func @transform_6(%arg0: i32, %arg1: i32) -> (i32, i32) {
    %c0_i32 = arith.constant 0 : i32
    %c0_i32_0 = arith.constant 0 : i32
    return %arg0, %c0_i32 : i32, i32
  }
}

</mosaic_0001>

<bundles_post_ra>
// kernel: tpu_custom_call.1
= control target key start
LH: loop header
LB: loop body
LE: loop exit
PB: predicated region body
PF: predicated region fallthrough
CT: control target
= control target key end

     0   :  { %s3927_s0 = inlined_call_operand.hbm [shape: f32[8,8,128], index: 0, kind: input, shape index: {}]   ;;  %s3928_s1 = inlined_call_operand.hbm [shape: bf16[2,128,512], index: 1, kind: input, shape index: {}]   ;;  %s3929_s2 = inlined_call_operand.hbm [shape: bf16[2,128,512], index: 2, kind: input, shape index: {}]   ;;  %s3930_s3 = inlined_call_operand.vmem [shape: f32[2,1,512], index: 3, kind: input, shape index: {}]   ;;  %s3931_s4 = inlined_call_operand.hbm [shape: bf16[128,128], index: 4, kind: input, shape index: {}]   ;;  %s3932_s5 = inlined_call_operand.vmem [shape: f32[1,128], index: 5, kind: input, shape index: {}]   ;;  %s3933_s6 = inlined_call_operand.hbm [shape: f32[8,128], index: 6, kind: output, shape index: {}]  }
   0x1   :  { %3955 = sst [smem:[#allocation31_spill]] %s3928_s1 }
   0x2   :  { %11 = vsyncpa [#allocation5], 0 }
   0x3   :  { %12 = vsyncpa [#allocation8], 0 }
   0x4   :  { %14 = vsyncpa [#allocation8 + $0x1], 0 }
   0x5   :  { %15 = vsyncpa [#allocation11], 0 }
   0x6   :  { %16 = vsyncpa [#allocation6], 0  ;;  %s2882_s21 = smov 0   ;;  %s2884_s22 = smov 0  }
   0x7   :  { %s2886_s23 = smov 0   ;;  %s2888_s24 = smov 0  }
   0x8   :  { %s2890_s25 = smov 0   ;;  %s2892_s26 = smov 0  }
   0x9 LB: > { %3956 = sst [smem:[#allocation17_spill]] %s2827_s25  ;;  %s31_s27 = sadd.s32 1, %s2827_s25  ;;  %s2831_s26 = sphi %s2892_s26, %s22_s26   ;;  %s2827_s25 = sphi %s2890_s25, %s3999_s25   ;;  %s2823_s24 = sphi %s2888_s24, %s3998_s24   ;;  %s2819_s23 = sphi %s2886_s23, %s4002_s23   ;;  %s2815_s22 = sphi %s2884_s22, %s4001_s22   ;;  %s2811_s21 = sphi %s2882_s21, %s4000_s21  }
   0xa   : > { %s67_s28 = sadd.s32 1, %s2819_s23  ;;  %p32_p0 = scmp.ge.s32.totalorder %s31_s27, 2 }
   0xb   : > { %p74_p1 = scmp.ne.s32.totalorder %s2819_s23, %s2815_s22  ;;  %p75_p2 = scmp.eq.s32.totalorder %s2831_s26, 0 }
   0xc   : > { %s4004_s27 = smov (%p32_p0, %s31_s27), 0  ;;  %p2422_p4 = scmp.lt.s32.totalorder %s2831_s26, 2 }
   0xd   : > { %3957 = sst [smem:[#allocation18_spill]] %s4004_s27  ;;  %p76_p3 = por %p75_p2, %p74_p1 }
   0xe   : > { %s64_s29 = ssub.s32 %s2827_s25, %s4004_s27  ;;  %s255_s30 = sand.u32 1, %s2831_s26  }
   0xf   : > { %p65_p5 = scmp.eq.s32.totalorder %s64_s29, 0  ;;  %s257_s7 = sand.u32 1, %s2819_s23  }
  0x10   : > { %s2359_s8 = sshll.u32 %s2827_s25, 12  ;;  %s2928_s10 = sshll.u32 %s257_s7, 8 }
  0x11   : > { %s2926_s9 = scalar_select %p65_p5, %s2819_s23, %s67_s28  }
  0x12   : > { %s3959_s1 = sld [smem:[#allocation31_spill]]  ;;  %p2937_p6 = pnand %p2422_p4, %p76_p3 }
  0x13   : > { %3958 = sst [smem:[#allocation19_spill]] %s2926_s9  ;;  %s259_s15 = scalar_lea.vmem [#allocation7], %s2928_s10 }
  0x14   : > { %s3960_s14 = scalar_select %p2937_p6, 1, 0 }
  0x15   : > { %s266_s16 = sshll.u32 %s259_s15, 4  ;;  %s2944_s17 = scalar_lea.sflag [#allocation8], %s255_s30  ;;  %s2942_s16 = int_to_ptr.vmem [resolvable:$true] %s266_s16 }
  0x16   : > { %p3937_p8 = pneg %p2937_p6 }
  0x18   : > { %s2935_s13 = scalar_lea.hbm %s3959_s1, %s2359_s8  ;;  %s2632_s28 = scalar_lea.hbm %s3959_s1, 8192 }
  0x19   : > { %s2627_s18 = scalar_lea.hbm %s2935_s13, 4096  ;;  %p2633_p11 = scmp.lt.u32.totalorder %s2935_s13, %s3959_s1 }
  0x1a   : > { %p2628_p7 = scmp.ne.s32.totalorder %s2935_s13, %s2627_s18  ;;  %p2634_p12 = scmp.lt.u32.totalorder %s2632_s28, %s2627_s18 }
  0x1b   : > { %p2636_p0 = scmp.lt.u32.totalorder %s2627_s18, %s2935_s13 }
  0x1c   : > { %p2630_p9 = pnand %p3937_p8, %p2628_p7  ;;  %p2635_p13 = por %p2634_p12, %p2633_p11 }
  0x1e   : > { %p2631_p10 = pneg %p2630_p9  ;;  %p2637_p1 = por %p2636_p0, %p2635_p13 }
  0x20   : > { %p2638_p2 = pnand %p2637_p1, %p2631_p10 }
  0x22   : > { %2641 = shalt.err (!%p2638_p2)
}
  0x23   : > { %s2642_s30 = scalar_lea.vmem %s2942_s16, 4096  ;;  %s2833_s11 = smov [#allocation7]  }
  0x24   : > { %p2643_p3 = scmp.ne.s32.totalorder %s2942_s16, %s2642_s30  ;;  %s2647_s12 = sshll.u32 %s2833_s11, 4  ;;  %s2648_s12 = int_to_ptr.vmem [resolvable:$false] %s2647_s12 }
  0x25   : > { %s2649_s15 = scalar_lea.vmem %s2648_s12, 8192  ;;  %p2650_p7 = scmp.lt.s32.totalorder %s2942_s16, %s2648_s12 }
  0x26   : > { %p2645_p4 = pnand %p2643_p3, %p3937_p8  ;;  %p2651_p9 = scmp.lt.s32.totalorder %s2649_s15, %s2642_s30 }
  0x28   : > { %p2646_p5 = pneg %p2645_p4  ;;  %p2652_p11 = por %p2651_p9, %p2650_p7 }
  0x2a   : > { %p2653_p12 = pnand %p2652_p11, %p2646_p5 }
  0x2c   : > { %2656 = shalt.err (!%p2653_p12)
}
  0x2d   : > { %s3934_s18 = smov 256   ;;  %s3935_s19 = smov 16  }
  0x2e   : > { %2416 = dma.hbm_to_vmem [thread:$0]  (!%p2937_p6), %s2935_s13, 4096, %s2942_s16, %s2944_s17, %s3934_s18, %s3934_s18, %s3935_s19  }
  0x2f   : > { %s2980_s29 = scalar_lea.hbm %s3929_s2, %s2359_s8  ;;  %s280_s7 = scalar_lea.vmem [#allocation9], %s2928_s10 }
  0x30   : > { %s287_s30 = sshll.u32 %s280_s7, 4  ;;  %s2986_s11 = sadd.s32 4294967295, %s2831_s26   ;;  %s2983_s30 = int_to_ptr.vmem [resolvable:$true] %s287_s30 }
  0x31   : > { %p80_p10 = scmp.ne.s32.totalorder %s2815_s22, %s2811_s21  ;;  %p3936_p13 = scmp.eq.s32.totalorder %s2986_s11, 0 }
  0x32   : > { %p2231_p0 = scmp.ge.s32.totalorder %s2831_s26, 1  ;;  %p211_p1 = scmp.lt.s32.totalorder %s2831_s26, 3 }
  0x33   : > { %p2995_p2 = por %p3936_p13, %p80_p10  ;;  %s2836_s10 = smov [#allocation4]  }
  0x34   : > { %p2999_p3 = pnand %p2231_p0, %p211_p1  ;;  %s225_s16 = sshll.u32 %s2836_s10, 4  ;;  %s226_s16 = int_to_ptr.vmem [resolvable:$true] %s225_s16 }
  0x35   : > { %s3961_s13 = scalar_select %p2995_p2, 1, 0 }
  0x36   : > { %s3962_s8 = scalar_select %p2999_p3, 1, 0 }
  0x37   : > { %p2406_p4 = pneg %p2999_p3  ;;  %s2837_s12 = smov [#allocation10]  }
  0x38   : > { %s238_s15 = sshll.u32 %s2837_s12, 4  ;;  %s2657_s7 = scalar_lea.hbm %s3927_s0, 1024  ;;  %s3011_s15 = int_to_ptr.vmem [resolvable:$true] %s238_s15 }
  0x39   : > { %p3007_p5 = pnand %p2406_p4, %p3936_p13  ;;  %p2658_p7 = scmp.ne.s32.totalorder %s3927_s0, %s2657_s7 }
  0x3a   : > { %p2664_p10 = scmp.lt.u32.totalorder %s2657_s7, %s3927_s0 }
  0x3b   : > { %p2659_p9 = pneg %p3007_p5 }
  0x3d   : > { %p2660_p11 = pnand %p2659_p9, %p2658_p7 }
  0x3f   : > { %p2661_p12 = pneg %p2660_p11 }
  0x41   : > { %p2666_p0 = pnand %p2664_p10, %p2661_p12 }
  0x43   : > { %2669 = shalt.err (!%p2666_p0)
}
  0x44   : > { %s2670_s12 = scalar_lea.vmem %s226_s16, 1024  ;;  %p2678_p8 = scmp.lt.s32.totalorder %s226_s16, %s226_s16 }
  0x45   : > { %p2671_p1 = scmp.ne.s32.totalorder %s226_s16, %s2670_s12  ;;  %p2679_p2 = scmp.lt.s32.totalorder %s2670_s12, %s2670_s12 }
  0x47   : > { %p2673_p4 = pnand %p2671_p1, %p2659_p9  ;;  %p2680_p3 = por %p2679_p2, %p2678_p8 }
  0x49   : > { %p2674_p13 = pneg %p2673_p4 }
  0x4b   : > { %p2681_p6 = pnand %p2680_p3, %p2674_p13 }
  0x4d   : > { %2684 = shalt.err (!%p2681_p6)
}
  0x4e   : > { %s2838_s18 = smov 128   ;;  %s2839_s20 = smov 8  }
  0x4f   : > { %2409 = dma.hbm_to_vmem [thread:$0]  (!%p3007_p5), %s3927_s0, 1024, %s226_s16, [#allocation5], %s2838_s18, %s2838_s18, %s2839_s20  }
  0x50   : > { %s2685_s10 = scalar_lea.hbm %s3931_s4, 1024 }
  0x51   : > { %p2686_p7 = scmp.ne.s32.totalorder %s3931_s4, %s2685_s10  ;;  %p2692_p13 = scmp.lt.u32.totalorder %s2685_s10, %s3931_s4 }
  0x53   : > { %p2688_p6 = pnand %p2686_p7, %p2659_p9 }
  0x55   : > { %p2689_p8 = pneg %p2688_p6 }
  0x57   : > { %p2694_p2 = pnand %p2692_p13, %p2689_p8 }
  0x59   : > { %2697 = shalt.err (!%p2694_p2)
}
  0x5a   : > { %s2698_s16 = scalar_lea.vmem %s3011_s15, 1024  ;;  %p2706_p10 = scmp.lt.s32.totalorder %s3011_s15, %s3011_s15 }
  0x5b   : > { %p2699_p3 = scmp.ne.s32.totalorder %s3011_s15, %s2698_s16  ;;  %p2707_p0 = scmp.lt.s32.totalorder %s2698_s16, %s2698_s16 }
  0x5d   : > { %p2701_p11 = pnand %p2699_p3, %p2659_p9  ;;  %p2708_p1 = por %p2707_p0, %p2706_p10 }
  0x5f   : > { %p2702_p12 = pneg %p2701_p11 }
  0x61   : > { %p2709_p4 = pnand %p2708_p1, %p2702_p12 }
  0x63   : > { %2712 = shalt.err (!%p2709_p4)
}
  0x64   : > { %s2840_s25 = smov 64   ;;  %s2841_s27 = smov 4  }
  0x65   : > { %2412 = dma.hbm_to_vmem [thread:$0]  (!%p3007_p5), %s3931_s4, 1024, %s3011_s15, [#allocation11], %s2840_s25, %s2840_s25, %s2841_s27  }
  0x66   : > { %s2713_s20 = scalar_lea.hbm %s2980_s29, 4096  ;;  %p3964_p7 = scmp.ne.s32.totalorder %s3960_s14, 0 }
  0x67   : > { %p2714_p9 = scmp.ne.s32.totalorder %s2980_s29, %s2713_s20  ;;  %s2718_s28 = scalar_lea.hbm %s3929_s2, 8192 }
  0x68   : > { %p3965_p6 = pneg %p3964_p7  ;;  %p2719_p2 = scmp.lt.u32.totalorder %s2980_s29, %s3929_s2 }
  0x69   : > { %p2720_p3 = scmp.lt.u32.totalorder %s2718_s28, %s2713_s20  ;;  %p2722_p12 = scmp.lt.u32.totalorder %s2713_s20, %s2980_s29 }
  0x6a   : > { %p2716_p8 = pnand %p2714_p9, %p3965_p6 }
  0x6b   : > { %p2721_p11 = por %p2720_p3, %p2719_p2 }
  0x6c   : > { %p2717_p13 = pneg %p2716_p8 }
  0x6d   : > { %p2723_p10 = por %p2722_p12, %p2721_p11 }
  0x6f   : > { %p2724_p0 = pnand %p2723_p10, %p2717_p13 }
  0x71   : > { %2727 = shalt.err (!%p2724_p0)
}
  0x72   : > { %s2728_s21 = scalar_lea.vmem %s2983_s30, 4096  ;;  %p3966_p1 = pmov %p3965_p6 }
  0x73   : > { %p2729_p5 = scmp.ne.s32.totalorder %s2983_s30, %s2728_s21  ;;  %s2842_s15 = smov [#allocation9]  }
  0x74   : > { %s2733_s12 = sshll.u32 %s2842_s15, 4  ;;  %s2734_s12 = int_to_ptr.vmem [resolvable:$false] %s2733_s12 }
  0x75   : > { %p2731_p4 = pnand %p2729_p5, %p3966_p1  ;;  %s2735_s16 = scalar_lea.vmem %s2734_s12, 8192 }
  0x76   : > { %p2736_p6 = scmp.lt.s32.totalorder %s2983_s30, %s2734_s12  ;;  %p2737_p8 = scmp.lt.s32.totalorder %s2735_s16, %s2728_s21 }
  0x77   : > { %p2732_p9 = pneg %p2731_p4 }
  0x78   : > { %p2738_p2 = por %p2737_p8, %p2736_p6 }
  0x7a   : > { %p2739_p3 = pnand %p2738_p2, %p2732_p9 }
  0x7c   : > { %2742 = shalt.err (!%p2739_p3)
}
  0x7d   : > { %s3967_s25 = smov 16   ;;  %s3968_s27 = smov 256  }
  0x7e   : > { %2419 = dma.hbm_to_vmem [thread:$0]  (!%p3964_p7), %s2980_s29, 4096, %s2983_s30, %s2944_s17, %s3968_s27, %s3968_s27, %s3967_s25  }
  0x7f   : > { %p3969_p13 = scmp.ne.s32.totalorder %s3962_s8, 0 }
  0x81   : > { %306 = sbr.rel (%p3969_p13) target bundleno = 2838 (0xb16), region = 44 }
  0x88   : > { %p3970_p11 = scmp.eq.s32.totalorder %s2986_s11, 0 }
  0x8a   : > { %2794 = dma.done.wait (%p3970_p11), [#allocation5], 1024   ;;  %p3971_p12 = pmov %p3970_p11 }
  0x8b   : > { %s312_s14 = sand.u32 1, %s2986_s11   ;;  %s314_s9 = sand.u32 1, %s2815_s22  }
  0x8c   : > { %2796 = vsyncadd (%p3971_p12), [#allocation5], 4294966272  ;;  %s2243_s18 = sshll.u32 %s314_s9, 8  ;;  %s313_s20 = scalar_lea.sflag [#allocation8], %s312_s14 }
  0x8d   : > { %s3095_s1 = scalar_lea.vmem [#allocation7], %s2243_s18  ;;  %p3972_p10 = scmp.ne.s32.totalorder %s3961_s13, 0 }
  0x8f   : > { %2798 = dma.done.wait (%p3972_p10), %s313_s20, 8192  }
  0x90   : > { %2800 = vsyncadd (%p3972_p10), %s313_s20, 4294959104  ;;  %s3101_s17 = scalar_lea.vmem [#allocation9], %s2243_s18  ;;  %p3973_p7 = pmov %p3970_p11 }
  0x92   : > { %2802 = dma.done.wait (%p3973_p7), [#allocation11], 1024   ;;  %p3974_p0 = pmov %p3973_p7 }
  0x93   : > { %v3108_v0 = vld [vmem:[%s3095_s1] sm:$0xff]  ;;  %v3111_v1 = vld [vmem:[%s3095_s1 + $0x8] sm:$0xff]  ;;  %v3114_v2 = vld [vmem:[%s3095_s1 + $0x10] sm:$0xff]  ;;  %p362_p5 = scmp.lt.s32.totalorder %s2823_s24, 1  ;;  %p2247_p1 = scmp.ne.s32.totalorder %s2823_s24, 0 }
  0x94   : > { %2804 = vsyncadd (%p3974_p0), [#allocation11], 4294966272  ;;  %v3117_v3 = vld [vmem:[%s3095_s1 + $0x18] sm:$0xff]  ;;  %v3120_v4 = vld [vmem:[%s3095_s1 + $0x20] sm:$0xff] }
  0x95   : > { %v3123_v5 = vld [vmem:[%s3095_s1 + $0x28] sm:$0xff]  ;;  %v3126_v6 = vld [vmem:[%s3095_s1 + $0x30] sm:$0xff]  ;;  %v3129_v7 = vld [vmem:[%s3095_s1 + $0x38] sm:$0xff]  ;;  %s363_s29 = scalar_select %p362_p5, %s2823_s24, 1 }
  0x96   : > { %v3132_v8 = vld [vmem:[%s3095_s1 + $0x40] sm:$0xff]  ;;  %v3135_v9 = vld [vmem:[%s3095_s1 + $0x48] sm:$0xff]  ;;  %v3138_v10 = vld [vmem:[%s3095_s1 + $0x50] sm:$0xff] }
  0x97   : > { %v3141_v11 = vld [vmem:[%s3095_s1 + $0x58] sm:$0xff]  ;;  %v3144_v12 = vld [vmem:[%s3095_s1 + $0x60] sm:$0xff]  ;;  %v3147_v13 = vld [vmem:[%s3095_s1 + $0x68] sm:$0xff]  ;;  %s2246_s30 = sshll.u32 %s363_s29, 2 }
  0x98   : > { %v3150_v14 = vld [vmem:[%s3095_s1 + $0x70] sm:$0xff]  ;;  %v3153_v15 = vld [vmem:[%s3095_s1 + $0x78] sm:$0xff]  ;;  %v3156_v16 = vld [vmem:[%s3095_s1 + $0x80] sm:$0xff]  ;;  %s365_s19 = scalar_lea.vmem %s3930_s3, %s2246_s30 }
  0x99   : > { %v3159_v17 = vld [vmem:[%s3095_s1 + $0x88] sm:$0xff]  ;;  %v3162_v18 = vld [vmem:[%s3095_s1 + $0x90] sm:$0xff]  ;;  %v3165_v19 = vld [vmem:[%s3095_s1 + $0x98] sm:$0xff] }
  0x9a   : > { %v3168_v20 = vld [vmem:[%s3095_s1 + $0xa0] sm:$0xff]  ;;  %v3172_v21 = vld [vmem:[%s3095_s1 + $0xa8] sm:$0xff]  ;;  %v3175_v22 = vld [vmem:[%s3095_s1 + $0xb0] sm:$0xff] }
  0x9b   : > { %v3178_v23 = vld [vmem:[%s3095_s1 + $0xb8] sm:$0xff]  ;;  %v3181_v24 = vld [vmem:[%s3095_s1 + $0xc0] sm:$0xff]  ;;  %v3184_v25 = vld [vmem:[%s3095_s1 + $0xc8] sm:$0xff] }
  0x9c   : > { %v3187_v26 = vld [vmem:[%s3095_s1 + $0xd0] sm:$0xff]  ;;  %v3190_v27 = vld [vmem:[%s3095_s1 + $0xd8] sm:$0xff]  ;;  %v3193_v28 = vld [vmem:[%s3095_s1 + $0xe0] sm:$0xff] }
  0x9d   : > { %v3196_v29 = vld [vmem:[%s3095_s1 + $0xe8] sm:$0xff]  ;;  %v3199_v30 = vld [vmem:[%s3095_s1 + $0xf0] sm:$0xff]  ;;  %v3202_v31 = vld [vmem:[%s3095_s1 + $0xf8] sm:$0xff] }
  0x9e   : > { %v3205_v32 = vld [vmem:[%s3101_s17] sm:$0xff]  ;;  %v3209_v33 = vld [vmem:[%s3101_s17 + $0x8] sm:$0xff]  ;;  %v3212_v34 = vld [vmem:[%s3101_s17 + $0x10] sm:$0xff] }
  0x9f   : > { %v3215_v35 = vld [vmem:[%s3101_s17 + $0x18] sm:$0xff]  ;;  %v3218_v36 = vld [vmem:[%s3101_s17 + $0x20] sm:$0xff]  ;;  %v3221_v37 = vld [vmem:[%s3101_s17 + $0x28] sm:$0xff] }
  0xa0   : > { %v3224_v38 = vld [vmem:[%s3101_s17 + $0x30] sm:$0xff]  ;;  %v3227_v39 = vld [vmem:[%s3101_s17 + $0x38] sm:$0xff]  ;;  %v3230_v40 = vld [vmem:[%s3101_s17 + $0x40] sm:$0xff] }
  0xa1   : > { %v3233_v41 = vld [vmem:[%s3101_s17 + $0x48] sm:$0xff]  ;;  %v3236_v42 = vld [vmem:[%s3101_s17 + $0x50] sm:$0xff]  ;;  %v3239_v43 = vld [vmem:[%s3101_s17 + $0x58] sm:$0xff] }
  0xa2   : > { %v3242_v44 = vld [vmem:[%s3101_s17 + $0x60] sm:$0xff]  ;;  %v3245_v45 = vld [vmem:[%s3101_s17 + $0x68] sm:$0xff]  ;;  %v3248_v46 = vld [vmem:[%s3101_s17 + $0x70] sm:$0xff] }
  0xa3   : > { %v3251_v47 = vld [vmem:[%s3101_s17 + $0x78] sm:$0xff]  ;;  %v3254_v48 = vld [vmem:[%s3101_s17 + $0x80] sm:$0xff]  ;;  %v3257_v49 = vld [vmem:[%s3101_s17 + $0x88] sm:$0xff] }
  0xa4   : > { %v3260_v50 = vld [vmem:[%s3101_s17 + $0x90] sm:$0xff]  ;;  %v3263_v51 = vld [vmem:[%s3101_s17 + $0x98] sm:$0xff]  ;;  %v3266_v52 = vld [vmem:[%s3101_s17 + $0xa0] sm:$0xff] }
  0xa5   : > { %v3269_v53 = vld [vmem:[%s3101_s17 + $0xa8] sm:$0xff]  ;;  %v3275_v54 = vld [vmem:[%s3101_s17 + $0xb0] sm:$0xff]  ;;  %v3278_v55 = vld [vmem:[%s3101_s17 + $0xb8] sm:$0xff]  ;;  %435 = sbr.rel (%p2247_p1) target bundleno = 176 (0xb0), region = 64 }
  0xa6   : > { %3975 = vst [vmem:[#allocation20_spill] sm:$0xff] %v3269_v53  ;;  %3976 = vst [vmem:[#allocation21_spill] sm:$0xff] %v3278_v55  ;;  %v3281_v56 = vld [vmem:[%s3101_s17 + $0xc0] sm:$0xff]  ;;  %v3284_v57 = vld [vmem:[%s3101_s17 + $0xc8] sm:$0xff] }
  0xa7   : > { %3977 = vst [vmem:[#allocation22_spill] sm:$0xff] %v3281_v56  ;;  %3978 = vst [vmem:[#allocation23_spill] sm:$0xff] %v3284_v57  ;;  %v3287_v58 = vld [vmem:[%s3101_s17 + $0xd0] sm:$0xff]  ;;  %v3290_v59 = vld [vmem:[%s3101_s17 + $0xd8] sm:$0xff] }
  0xa8   : > { %3979 = vst [vmem:[#allocation24_spill] sm:$0xff] %v3287_v58  ;;  %3980 = vst [vmem:[#allocation25_spill] sm:$0xff] %v3290_v59  ;;  %v3293_v60 = vld [vmem:[%s3101_s17 + $0xe0] sm:$0xff]  ;;  %v3296_v61 = vld [vmem:[%s3101_s17 + $0xe8] sm:$0xff] }
  0xa9   : > { %3981 = vst [vmem:[#allocation26_spill] sm:$0xff] %v3293_v60  ;;  %3982 = vst [vmem:[#allocation27_spill] sm:$0xff] %v3296_v61  ;;  %v3299_v62 = vld [vmem:[%s3101_s17 + $0xf0] sm:$0xff]  ;;  %v3302_v63 = vld [vmem:[%s3101_s17 + $0xf8] sm:$0xff] }
  0xaa   : > { %3983 = vst [vmem:[#allocation28_spill] sm:$0xff] %v3299_v62  ;;  %3984 = vst [vmem:[#allocation29_spill] sm:$0xff] %v3302_v63  ;;  %v3304_v53 = vld [vmem:[%s365_s19] sm:$0xf]  ;;  %v437_v55 = vld [vmem:[#allocation4 + $0x8] sm:$0xff] (!%p2247_p1) }
  0xab   : > { %3985 = vst [vmem:[#allocation30_spill] sm:$0xff] %v3304_v53  ;;  %v436_v56 = vld [vmem:[#allocation4] sm:$0xff] (!%p2247_p1)  ;;  %v438_v57 = vld [vmem:[#allocation4 + $0x10] sm:$0xff] (!%p2247_p1)  ;;  %445 = vst [vmem:[#allocation2 + $0x8] sm:$0xff] (!%p2247_p1), %v437_v55 }
  0xac   : > { %444 = vst [vmem:[#allocation2] sm:$0xff] %v436_v56  ;;  %446 = vst [vmem:[#allocation2 + $0x10] sm:$0xff] %v438_v57  ;;  %v439_v59 = vld [vmem:[#allocation4 + $0x18] sm:$0xff]  ;;  %v440_v58 = vld [vmem:[#allocation4 + $0x20] sm:$0xff] }
  0xad   : > { %v441_v60 = vld [vmem:[#allocation4 + $0x28] sm:$0xff]  ;;  %447 = vst [vmem:[#allocation2 + $0x18] sm:$0xff] %v439_v59  ;;  %448 = vst [vmem:[#allocation2 + $0x20] sm:$0xff] %v440_v58  ;;  %v442_v61 = vld [vmem:[#allocation4 + $0x30] sm:$0xff] }
  0xae   : > { %449 = vst [vmem:[#allocation2 + $0x28] sm:$0xff] %v441_v60  ;;  %v443_v62 = vld [vmem:[#allocation4 + $0x38] sm:$0xff]  ;;  %450 = vst [vmem:[#allocation2 + $0x30] sm:$0xff] %v442_v61 }
  0xaf   : > { %451 = vst [vmem:[#allocation2 + $0x38] sm:$0xff] %v443_v62 }
  0xb0 PF: > { %v2249_v53 = vcombine.high %v3108_v0, %v3114_v2  ;;  %v2251_v63 = vcombine.high %v3111_v1, %v3117_v3  ;;  %v2248_v55 = vcombine.low %v3108_v0, %v3114_v2  ;;  %v2250_v56 = vcombine.low %v3111_v1, %v3117_v3  ;;  %p2315_p4 = scmp.ge.s32.totalorder %s2823_s24, 1 }
  0xb1   : > { %v2253_v57 = vcombine.high %v3120_v4, %v3126_v6  ;;  %v2255_v58 = vcombine.high %v3123_v5, %v3129_v7  ;;  %v2252_v59 = vcombine.low %v3120_v4, %v3126_v6  ;;  %v2254_v60 = vcombine.low %v3123_v5, %v3129_v7 }
  0xb2   : > { %624 = vmatprep.subr.bf16.mxu0 %v2249_v53  ;;  %697 = vmatprep.subr.bf16.mxu1 %v2251_v63  ;;  %v2257_v0 = vcombine.high %v3132_v8, %v3138_v10  ;;  %v2259_v1 = vcombine.high %v3135_v9, %v3141_v11  ;;  %v2843_v2 = vmov 0   ;;  %v2256_v3 = vcombine.low %v3132_v8, %v3138_v10 }
  0xb3   : > { %625 = vmatpush1.bf16.msra.mxu0 %v2248_v55  ;;  %698 = vmatpush1.bf16.msra.mxu1 %v2250_v56  ;;  %v2258_v4 = vcombine.low %v3135_v9, %v3141_v11  ;;  %v2261_v5 = vcombine.high %v3144_v12, %v3150_v14  ;;  %v2263_v6 = vcombine.high %v3147_v13, %v3153_v15 }
  0xb4   : > { %626 = vmatprep.subr.bf16.mxu0 %v2253_v57  ;;  %699 = vmatprep.subr.bf16.mxu1 %v2255_v58  ;;  %v2260_v7 = vcombine.low %v3144_v12, %v3150_v14  ;;  %v2262_v53 = vcombine.low %v3147_v13, %v3153_v15  ;;  %v2265_v8 = vcombine.high %v3156_v16, %v3162_v18  ;;  %v3986_v58 = vld [vmem:[#allocation21_spill] sm:$0xff] }
  0xb5   : > { %656 = vmatprep.mubr.bf16.mxu0 %v2843_v2  ;;  %729 = vmatprep.mubr.bf16.mxu1 %v2843_v2  ;;  %v2267_v9 = vcombine.high %v3159_v17, %v3165_v19  ;;  %v2264_v10 = vcombine.low %v3156_v16, %v3162_v18  ;;  %v2266_v11 = vcombine.low %v3159_v17, %v3165_v19 }
  0xb6   : > { %v2269_v12 = vcombine.high %v3168_v20, %v3175_v22  ;;  %v2271_v13 = vcombine.high %v3172_v21, %v3178_v23  ;;  %v2268_v14 = vcombine.low %v3168_v20, %v3175_v22  ;;  %v2270_v15 = vcombine.low %v3172_v21, %v3178_v23 }
  0xb7   : > { %627 = vmatpush1.bf16.msra.mxu0 %v2252_v59  ;;  %700 = vmatpush1.bf16.msra.mxu1 %v2254_v60  ;;  %v2273_v16 = vcombine.high %v3181_v24, %v3187_v26  ;;  %v2275_v17 = vcombine.high %v3184_v25, %v3190_v27  ;;  %v2272_v18 = vcombine.low %v3181_v24, %v3187_v26  ;;  %v452_v24 = vld [vmem:[#allocation2] sm:$0xff]  ;;  %v453_v26 = vld [vmem:[#allocation2 + $0x8] sm:$0xff] }
  0xb8   : > { %628 = vmatprep.subr.bf16.mxu0 %v2257_v0  ;;  %701 = vmatprep.subr.bf16.mxu1 %v2259_v1  ;;  %v2274_v19 = vcombine.low %v3184_v25, %v3190_v27  ;;  %v2277_v20 = vcombine.high %v3193_v28, %v3199_v30  ;;  %v2279_v21 = vcombine.high %v3196_v29, %v3202_v31  ;;  %v3987_v59 = vld [vmem:[#allocation20_spill] sm:$0xff]  ;;  %v3989_v1 = vld [vmem:[#allocation22_spill] sm:$0xff] }
  0xb9   : > { %v2276_v22 = vcombine.low %v3193_v28, %v3199_v30  ;;  %v2278_v23 = vcombine.low %v3196_v29, %v3202_v31  ;;  %v3375_v25 = vcombine.high %v3205_v32, %v3212_v34  ;;  %v3379_v27 = vcombine.high %v3209_v33, %v3215_v35  ;;  %v3988_v0 = vld [vmem:[#allocation24_spill] sm:$0xff] }
  0xba   : > { %v460_v61 = vpack.c.bf16 %v453_v26, %v452_v24  ;;  %v3383_v28 = vcombine.low %v3205_v32, %v3212_v34  ;;  %v3387_v29 = vcombine.low %v3209_v33, %v3215_v35  ;;  %v3393_v30 = vcombine.high %v3218_v36, %v3224_v38  ;;  %v454_v34 = vld [vmem:[#allocation2 + $0x10] sm:$0xff]  ;;  %v455_v35 = vld [vmem:[#allocation2 + $0x18] sm:$0xff] }
  0xbb   : > { %629 = vmatpush1.bf16.msra.mxu0 %v2256_v3  ;;  %702 = vmatpush1.bf16.msra.mxu1 %v2258_v4  ;;  %v3397_v31 = vcombine.high %v3221_v37, %v3227_v39  ;;  %v3403_v32 = vcombine.low %v3218_v36, %v3224_v38  ;;  %v3407_v33 = vcombine.low %v3221_v37, %v3227_v39  ;;  %v3990_v4 = vld [vmem:[#allocation25_spill] sm:$0xff] }
  0xbc   : > { %630 = vmatprep.subr.bf16.mxu0 %v2261_v5  ;;  %703 = vmatprep.subr.bf16.mxu1 %v2263_v6  ;;  %v3413_v62 = vcombine.high %v3230_v40, %v3236_v42  ;;  %v3417_v63 = vcombine.high %v3233_v41, %v3239_v43  ;;  %v461_v36 = vpack.c.bf16 %v455_v35, %v454_v34  ;;  %v3991_v5 = vld [vmem:[#allocation23_spill] sm:$0xff] }
  0xbd   : > { %v3425_v37 = vcombine.low %v3230_v40, %v3236_v42  ;;  %v3429_v38 = vcombine.low %v3233_v41, %v3239_v43  ;;  %v3435_v39 = vcombine.high %v3242_v44, %v3248_v46  ;;  %v3439_v55 = vcombine.high %v3245_v45, %v3251_v47  ;;  %v456_v42 = vld [vmem:[#allocation2 + $0x20] sm:$0xff]  ;;  %v457_v43 = vld [vmem:[#allocation2 + $0x28] sm:$0xff] }
  0xbe   : > { %v3445_v40 = vcombine.low %v3242_v44, %v3248_v46  ;;  %v3449_v41 = vcombine.low %v3245_v45, %v3251_v47  ;;  %v3455_v56 = vcombine.high %v3254_v48, %v3260_v50  ;;  %v3459_v57 = vcombine.high %v3257_v49, %v3263_v51 }
  0xbf   : > { %631 = vmatpush1.bf16.msra.mxu0 %v2260_v7  ;;  %704 = vmatpush1.bf16.msra.mxu1 %v2262_v53  ;;  %v462_v44 = vpack.c.bf16 %v457_v43, %v456_v42  ;;  %v3467_v45 = vcombine.low %v3254_v48, %v3260_v50  ;;  %v3471_v46 = vcombine.low %v3257_v49, %v3263_v51  ;;  %v458_v50 = vld [vmem:[#allocation2 + $0x30] sm:$0xff]  ;;  %v459_v51 = vld [vmem:[#allocation2 + $0x38] sm:$0xff]  ;;  %v3992_v53 = vld [vmem:[#allocation28_spill] sm:$0xff] }
  0xc0   : > { %632 = vmatprep.subr.bf16.mxu0 %v2265_v8  ;;  %705 = vmatprep.subr.bf16.mxu1 %v2267_v9  ;;  %v3477_v47 = vcombine.high %v3266_v52, %v3275_v54  ;;  %v3481_v60 = vcombine.high %v3987_v59, %v3986_v58  ;;  %v3487_v48 = vcombine.low %v3266_v52, %v3275_v54  ;;  %v3993_v8 = vld [vmem:[#allocation26_spill] sm:$0xff] }
  0xc1   : > { %v3491_v49 = vcombine.low %v3987_v59, %v3986_v58  ;;  %v3497_v3 = vcombine.high %v3989_v1, %v3988_v0  ;;  %v3501_v6 = vcombine.high %v3991_v5, %v3990_v4  ;;  %v463_v52 = vpack.c.bf16 %v459_v51, %v458_v50 }
  0xc2   : > { %v3509_v54 = vcombine.low %v3989_v1, %v3988_v0  ;;  %v3513_v7 = vcombine.low %v3991_v5, %v3990_v4  ;;  %v3519_v9 = vcombine.high %v3993_v8, %v3992_v53 }
  0xc3   : > { %633 = vmatpush1.bf16.msra.mxu0 %v2264_v10  ;;  %706 = vmatpush1.bf16.msra.mxu1 %v2266_v11  ;;  %v3994_v10 = vld [vmem:[#allocation29_spill] sm:$0xff]  ;;  %v3995_v11 = vld [vmem:[#allocation27_spill] sm:$0xff] }
  0xc4   : > { %634 = vmatprep.subr.bf16.mxu0 %v2269_v12  ;;  %707 = vmatprep.subr.bf16.mxu1 %v2271_v13  ;;  %v3523_v12 = vcombine.high %v3995_v11, %v3994_v10  ;;  %v3529_v13 = vcombine.low %v3993_v8, %v3992_v53 }
  0xc7   : > { %635 = vmatpush1.bf16.msra.mxu0 %v2268_v14  ;;  %708 = vmatpush1.bf16.msra.mxu1 %v2270_v15  ;;  %v3533_v14 = vcombine.low %v3995_v11, %v3994_v10  ;;  %v771_v15 = vlaneseq }
  0xc8   : > { %636 = vmatprep.subr.bf16.mxu0 %v2273_v16  ;;  %709 = vmatprep.subr.bf16.mxu1 %v2275_v17 }
  0xc9   : > { %v772_v16 = vshrl.u32 %v771_v15, 7 }
  0xcb   : > { %637 = vmatpush1.bf16.msra.mxu0 %v2272_v18  ;;  %710 = vmatpush1.bf16.msra.mxu1 %v2274_v19  ;;  %v773_v17 = vsub.s32 0, %v772_v16  ;;  %v781_v18 = vsub.s32 2, %v772_v16  ;;  %v777_v19 = vsub.s32 1, %v772_v16 }
  0xcc   : > { %638 = vmatprep.subr.bf16.mxu0 %v2277_v20  ;;  %711 = vmatprep.subr.bf16.mxu1 %v2279_v21  ;;  %v785_v20 = vsub.s32 3, %v772_v16  ;;  %v3996_v21 = vld [vmem:[#allocation30_spill] sm:$0xff] }
  0xcd   : > { %v3550_v24 = vrot.slane %v3996_v21, %v777_v19 }
  0xce   : > { %v3553_v26 = vrot.slane %v3996_v21, %v785_v20 }
  0xcf   : > { %639 = vmatpush1.bf16.msra.mxu0 %v2276_v22  ;;  %712 = vmatpush1.bf16.msra.mxu1 %v2278_v23  ;;  %v3544_v22 = vrot.slane %v3996_v21, %v773_v17  ;;  %v3547_v23 = vrot.slane %v3996_v21, %v781_v18 }
  0xd0   : > { %1019 = vmatprep.subr.bf16.mxu0 %v3375_v25  ;;  %1060 = vmatprep.subr.bf16.mxu1 %v3379_v27 }
  0xd2   : > { %657 = vmatmul.mubr.bf16.vlgmr.msra.gmra.mrb[0].mxu0 %v460_v61  ;;  %730 = vmatmul.mubr.bf16.vlgmr.msra.gmra.mrb[0].mxu1 %v460_v61 }
  0xd3   : > { %1020 = vmatpush1.bf16.msra.mxu0 %v3383_v28  ;;  %1061 = vmatpush1.bf16.msra.mxu1 %v3387_v29 }
  0xd4   : > { %1021 = vmatprep.subr.bf16.mxu0 %v3393_v30  ;;  %1062 = vmatprep.subr.bf16.mxu1 %v3397_v31 }
  0xd5   : > { %666 = vmatprep.mubr.bf16.mxu0 %v2843_v2  ;;  %739 = vmatprep.mubr.bf16.mxu1 %v2843_v2 }
  0xd7   : > { %1022 = vmatpush1.bf16.msra.mxu0 %v3403_v32  ;;  %1063 = vmatpush1.bf16.msra.mxu1 %v3407_v33 }
  0xd8   : > { %1023 = vmatprep.subr.bf16.mxu0 %v3413_v62  ;;  %1064 = vmatprep.subr.bf16.mxu1 %v3417_v63 }
  0xda   : > { %667 = vmatmul.mubr.bf16.gmra.mrb[4].mxu0 %v461_v36  ;;  %740 = vmatmul.mubr.bf16.gmra.mrb[4].mxu1 %v461_v36 }
  0xdb   : > { %1024 = vmatpush1.bf16.msra.mxu0 %v3425_v37  ;;  %1065 = vmatpush1.bf16.msra.mxu1 %v3429_v38 }
  0xdc   : > { %1025 = vmatprep.subr.bf16.mxu0 %v3435_v39  ;;  %1066 = vmatprep.subr.bf16.mxu1 %v3439_v55 }
  0xdd   : > { %676 = vmatprep.mubr.bf16.mxu0 %v2843_v2  ;;  %749 = vmatprep.mubr.bf16.mxu1 %v2843_v2 }
  0xdf   : > { %1026 = vmatpush1.bf16.msra.mxu0 %v3445_v40  ;;  %1067 = vmatpush1.bf16.msra.mxu1 %v3449_v41 }
  0xe0   : > { %1027 = vmatprep.subr.bf16.mxu0 %v3455_v56  ;;  %1068 = vmatprep.subr.bf16.mxu1 %v3459_v57 }
  0xe2   : > { %677 = vmatmul.mubr.bf16.gmra.mrb[8].mxu0 %v462_v44  ;;  %750 = vmatmul.mubr.bf16.gmra.mrb[8].mxu1 %v462_v44 }
  0xe3   : > { %1028 = vmatpush1.bf16.msra.mxu0 %v3467_v45  ;;  %1069 = vmatpush1.bf16.msra.mxu1 %v3471_v46 }
  0xe4   : > { %1029 = vmatprep.subr.bf16.mxu0 %v3477_v47  ;;  %1070 = vmatprep.subr.bf16.mxu1 %v3481_v60 }
  0xe5   : > { %686 = vmatprep.mubr.bf16.mxu0 %v2843_v2  ;;  %759 = vmatprep.mubr.bf16.mxu1 %v2843_v2 }
  0xe7   : > { %1030 = vmatpush1.bf16.msra.mxu0 %v3487_v48  ;;  %1071 = vmatpush1.bf16.msra.mxu1 %v3491_v49 }
  0xe8   : > { %1031 = vmatprep.subr.bf16.mxu0 %v3497_v3  ;;  %1072 = vmatprep.subr.bf16.mxu1 %v3501_v6 }
  0xea   : > { %687 = vmatmul.mubr.bf16.gmra.mrb[12].mxu0 %v463_v52  ;;  %760 = vmatmul.mubr.bf16.gmra.mrb[12].mxu1 %v463_v52 }
  0xeb   : > { %1032 = vmatpush1.bf16.msra.mxu0 %v3509_v54  ;;  %1073 = vmatpush1.bf16.msra.mxu1 %v3513_v7 }
  0xec   : > { %1033 = vmatprep.subr.bf16.mxu0 %v3519_v9  ;;  %1074 = vmatprep.subr.bf16.mxu1 %v3523_v12 }
  0xed   : > { %1051 = vmatprep.mubr.bf16.mxu0 %v2843_v2  ;;  %1092 = vmatprep.mubr.bf16.mxu1 %v2843_v2 }
  0xef   : > { %1034 = vmatpush1.bf16.msra.mxu0 %v3529_v13  ;;  %1075 = vmatpush1.bf16.msra.mxu1 %v3533_v14 }
  0xf2   : > { %1052 = vmatmul.mubr.bf16.vlgmr.msra.gmra.mrb[16].mxu0 %v2843_v2  ;;  %1093 = vmatmul.mubr.bf16.vlgmr.msra.gmra.mrb[16].mxu1 %v2843_v2 }
 0x1a5   : > { %v658_v61 = vpop.f32.mrb[0].mxu0  ;;  %v731_v34 = vpop.f32.mrb[0].mxu1 }
 0x1a6   : > { %v3556_v35 = vadd.f32 %v3544_v22, %v658_v61  ;;  %v660_v36 = vpop.f32.mrb[1].mxu0  ;;  %v3559_v42 = vadd.f32 %v3547_v23, %v731_v34  ;;  %v733_v43 = vpop.f32.mrb[1].mxu1 }
 0x1a7   : > { %v3562_v44 = vadd.f32 %v3550_v24, %v660_v36  ;;  %v662_v58 = vpop.f32.mrb[2].mxu0  ;;  %v3565_v59 = vadd.f32 %v3553_v26, %v733_v43  ;;  %v735_v50 = vpop.f32.mrb[2].mxu1 }
 0x1a8   : > { %v795_v51 = vadd.f32 %v3544_v22, %v662_v58  ;;  %v664_v0 = vpop.f32.mrb[3].mxu0  ;;  %v797_v1 = vadd.f32 %v3547_v23, %v735_v50  ;;  %v737_v4 = vpop.f32.mrb[3].mxu1 }
 0x1a9   : > { %v796_v5 = vadd.f32 %v3550_v24, %v664_v0  ;;  %v798_v52 = vadd.f32 %v3553_v26, %v737_v4 }
 0x1aa   : > { %827 = vst [vmem:[#allocation3 + $0x20] sm:$0xff] %v795_v51  ;;  %829 = vst [vmem:[#allocation3 + $0x30] sm:$0xff] %v797_v1 }
 0x1ab   : > { %828 = vst [vmem:[#allocation3 + $0x28] sm:$0xff] %v796_v5  ;;  %830 = vst [vmem:[#allocation3 + $0x38] sm:$0xff] %v798_v52 }
 0x1ad   : > { %v668_v53 = vpop.f32.mrb[4].mxu0  ;;  %v741_v8 = vpop.f32.mrb[4].mxu1 }
 0x1ae   : > { %v799_v10 = vadd.f32 %v3544_v22, %v668_v53  ;;  %v670_v11 = vpop.f32.mrb[5].mxu0  ;;  %v801_v15 = vadd.f32 %v3547_v23, %v741_v8  ;;  %v743_v16 = vpop.f32.mrb[5].mxu1 }
 0x1af   : > { %v800_v17 = vadd.f32 %v3550_v24, %v670_v11  ;;  %v672_v18 = vpop.f32.mrb[6].mxu0  ;;  %v802_v19 = vadd.f32 %v3553_v26, %v743_v16  ;;  %v745_v20 = vpop.f32.mrb[6].mxu1 }
 0x1b0   : > { %831 = vst [vmem:[#allocation3 + $0x40] sm:$0xff] %v799_v10  ;;  %v803_v21 = vadd.f32 %v3544_v22, %v672_v18  ;;  %v674_v61 = vpop.f32.mrb[7].mxu0  ;;  %833 = vst [vmem:[#allocation3 + $0x50] sm:$0xff] %v801_v15  ;;  %v805_v34 = vadd.f32 %v3547_v23, %v745_v20  ;;  %v747_v36 = vpop.f32.mrb[7].mxu1 }
 0x1b1   : > { %832 = vst [vmem:[#allocation3 + $0x48] sm:$0xff] %v800_v17  ;;  %v804_v43 = vadd.f32 %v3550_v24, %v674_v61  ;;  %834 = vst [vmem:[#allocation3 + $0x58] sm:$0xff] %v802_v19  ;;  %v806_v58 = vadd.f32 %v3553_v26, %v747_v36 }
 0x1b2   : > { %835 = vst [vmem:[#allocation3 + $0x60] sm:$0xff] %v803_v21  ;;  %837 = vst [vmem:[#allocation3 + $0x70] sm:$0xff] %v805_v34 }
 0x1b3   : > { %836 = vst [vmem:[#allocation3 + $0x68] sm:$0xff] %v804_v43  ;;  %838 = vst [vmem:[#allocation3 + $0x78] sm:$0xff] %v806_v58 }
 0x1b5   : > { %v678_v50 = vpop.f32.mrb[8].mxu0  ;;  %v751_v51 = vpop.f32.mrb[8].mxu1 }
 0x1b6   : > { %v807_v0 = vadd.f32 %v3544_v22, %v678_v50  ;;  %v680_v1 = vpop.f32.mrb[9].mxu0  ;;  %v809_v4 = vadd.f32 %v3547_v23, %v751_v51  ;;  %v753_v5 = vpop.f32.mrb[9].mxu1 }
 0x1b7   : > { %v808_v52 = vadd.f32 %v3550_v24, %v680_v1  ;;  %v682_v53 = vpop.f32.mrb[10].mxu0  ;;  %v810_v8 = vadd.f32 %v3553_v26, %v753_v5  ;;  %v755_v10 = vpop.f32.mrb[10].mxu1 }
 0x1b8   : > { %839 = vst [vmem:[#allocation3 + $0x80] sm:$0xff] %v807_v0  ;;  %v811_v11 = vadd.f32 %v3544_v22, %v682_v53  ;;  %v684_v15 = vpop.f32.mrb[11].mxu0  ;;  %841 = vst [vmem:[#allocation3 + $0x90] sm:$0xff] %v809_v4  ;;  %v813_v16 = vadd.f32 %v3547_v23, %v755_v10  ;;  %v757_v17 = vpop.f32.mrb[11].mxu1 }
 0x1b9   : > { %840 = vst [vmem:[#allocation3 + $0x88] sm:$0xff] %v808_v52  ;;  %v812_v18 = vadd.f32 %v3550_v24, %v684_v15  ;;  %842 = vst [vmem:[#allocation3 + $0x98] sm:$0xff] %v810_v8  ;;  %v814_v19 = vadd.f32 %v3553_v26, %v757_v17 }
 0x1ba   : > { %843 = vst [vmem:[#allocation3 + $0xa0] sm:$0xff] %v811_v11  ;;  %845 = vst [vmem:[#allocation3 + $0xb0] sm:$0xff] %v813_v16 }
 0x1bb   : > { %844 = vst [vmem:[#allocation3 + $0xa8] sm:$0xff] %v812_v18  ;;  %846 = vst [vmem:[#allocation3 + $0xb8] sm:$0xff] %v814_v19 }
 0x1bd   : > { %v688_v20 = vpop.f32.mrb[12].mxu0  ;;  %v761_v21 = vpop.f32.mrb[12].mxu1 }
 0x1be   : > { %v815_v61 = vadd.f32 %v3544_v22, %v688_v20  ;;  %v690_v34 = vpop.f32.mrb[13].mxu0  ;;  %v817_v36 = vadd.f32 %v3547_v23, %v761_v21  ;;  %v763_v43 = vpop.f32.mrb[13].mxu1 }
 0x1bf   : > { %v816_v58 = vadd.f32 %v3550_v24, %v690_v34  ;;  %v692_v50 = vpop.f32.mrb[14].mxu0  ;;  %v818_v51 = vadd.f32 %v3553_v26, %v763_v43  ;;  %v765_v0 = vpop.f32.mrb[14].mxu1 }
 0x1c0   : > { %847 = vst [vmem:[#allocation3 + $0xc0] sm:$0xff] %v815_v61  ;;  %v819_v1 = vadd.f32 %v3544_v22, %v692_v50  ;;  %v694_v4 = vpop.f32.mrb[15].mxu0  ;;  %849 = vst [vmem:[#allocation3 + $0xd0] sm:$0xff] %v817_v36  ;;  %v821_v5 = vadd.f32 %v3547_v23, %v765_v0  ;;  %v767_v52 = vpop.f32.mrb[15].mxu1 }
 0x1c1   : > { %848 = vst [vmem:[#allocation3 + $0xc8] sm:$0xff] %v816_v58  ;;  %v820_v53 = vadd.f32 %v3550_v24, %v694_v4  ;;  %850 = vst [vmem:[#allocation3 + $0xd8] sm:$0xff] %v818_v51  ;;  %v822_v8 = vadd.f32 %v3553_v26, %v767_v52 }
 0x1c2   : > { %851 = vst [vmem:[#allocation3 + $0xe0] sm:$0xff] %v819_v1  ;;  %853 = vst [vmem:[#allocation3 + $0xf0] sm:$0xff] %v821_v5 }
 0x1c3   : > { %852 = vst [vmem:[#allocation3 + $0xe8] sm:$0xff] %v820_v53  ;;  %854 = vst [vmem:[#allocation3 + $0xf8] sm:$0xff] %v822_v8 }
 0x1c5   : > { %v1053_v10 = vpop.f32.mrb[16].mxu0  ;;  %v1094_v11 = vpop.f32.mrb[16].mxu1 }
 0x1c6   : > { %v1101_v15 = vadd.f32 %v1053_v10, %v3556_v35  ;;  %v1103_v22 = vadd.f32 %v1094_v11, %v3559_v42  ;;  %v1055_v16 = vpop.f32.mrb[17].mxu0  ;;  %v1096_v17 = vpop.f32.mrb[17].mxu1 }
 0x1c7   : > { %v1102_v23 = vadd.f32 %v1055_v16, %v3562_v44  ;;  %v1104_v18 = vadd.f32 %v1096_v17, %v3565_v59  ;;  %v1057_v24 = vpop.f32.mrb[18].mxu0  ;;  %v1098_v19 = vpop.f32.mrb[18].mxu1 }
 0x1c8   : > { %v2312_v20 = vmul.f32 -1.442695, %v1101_v15  ;;  %v1058_v26 = vpop.f32.mrb[19].mxu0  ;;  %v1099_v21 = vpop.f32.mrb[19].mxu1 }
 0x1c9   : > { %v2313_v61 = vmul.f32 -1.442695, %v1102_v23  ;;  %v2314_v34 = vmul.f32 -1.442695, %v1104_v18 }
 0x1ca   : > { %2487 = vpow2.f32 %v2312_v20 }
 0x1cb   : > { %2489 = vpow2.f32 %v2313_v61 }
 0x1cc   : > { %2491 = vpow2.f32 %v2314_v34 }
 0x1cd   : > { %2493 = vtanh.f32 %v1103_v22 }
 0x1d4   : > { %v2488_v36 = vpop.eup %2487 }
 0x1d5   : > { %v2490_v43 = vpop.eup %2489  ;;  %v1108_v35 = vadd.f32 1.0, %v2488_v36 }
 0x1d6   : > { %v1114_v42 = vadd.f32 1.0, %v2490_v43  ;;  %v2492_v44 = vpop.eup %2491 }
 0x1d7   : > { %2495 = vrcp.f32 %v1108_v35  ;;  %v2494_v58 = vpop.eup %2493  ;;  %v1121_v0 = vadd.f32 1.0, %v2492_v44 }
 0x1d8   : > { %2497 = vrcp.f32 %v1114_v42 }
 0x1d9   : > { %2499 = vrcp.f32 %v1121_v0 }
 0x1e1   : > { %v2496_v59 = vpop.eup %2495 }
 0x1e2   : > { %v2498_v50 = vpop.eup %2497  ;;  %v1125_v51 = vmul.f32 %v2496_v59, %v2494_v58 }
 0x1e3   : > { %v1124_v1 = vmul.f32 0.0, %v2498_v50  ;;  %v2500_v5 = vpop.eup %2499 }
 0x1e5   : > { %v3599_v4 = vadd.f32 %v1125_v51, %v1124_v1 }
 0x1e7   : > { %2501 = vtanh.f32 %v3599_v4 }
 0x1ec   : > { %1132 = sbr.rel (%p2315_p4) target bundleno = 501 (0x1f5), region = 68 }
 0x1f1   : > { %v2502_v52 = vpop.eup %2501 }
 0x1f2   : > { %v1128_v53 = vmul.f32 %v2502_v52, %v2500_v5 }
 0x1f4   : > { %1133 = vst [vmem:[#allocation2] sm:$0xff] %v1128_v53 }
 0x1f5 PF: > { %1140 = vmatprep.subr.bf16.mxu0 %v3375_v25  ;;  %1181 = vmatprep.subr.bf16.mxu1 %v3379_v27  ;;  %v1139_v8 = vpack.c.bf16 %v1128_v53, %v1128_v53  ;;  %v1135_v10 = vld [vmem:[#allocation3 + $0x20] sm:$0xff]  ;;  %v1136_v11 = vld [vmem:[#allocation3 + $0x28] sm:$0xff]  ;;  %v1138_v34 = vld [vmem:[#allocation3 + $0x38] sm:$0xff] }
 0x1f6   : > { %1141 = vmatpush1.bf16.msra.mxu0 %v3383_v28  ;;  %1182 = vmatpush1.bf16.msra.mxu1 %v3387_v29  ;;  %v1137_v43 = vld [vmem:[#allocation3 + $0x30] sm:$0xff] }
 0x1f7   : > { %1142 = vmatprep.subr.bf16.mxu0 %v3393_v30  ;;  %1183 = vmatprep.subr.bf16.mxu1 %v3397_v31 }
 0x1f8   : > { %1172 = vmatprep.mubr.bf16.mxu0 %v2843_v2  ;;  %1213 = vmatprep.mubr.bf16.mxu1 %v2843_v2 }
 0x1fa   : > { %1143 = vmatpush1.bf16.msra.mxu0 %v3403_v32  ;;  %1184 = vmatpush1.bf16.msra.mxu1 %v3407_v33 }
 0x1fb   : > { %1144 = vmatprep.subr.bf16.mxu0 %v3413_v62  ;;  %1185 = vmatprep.subr.bf16.mxu1 %v3417_v63 }
 0x1fe   : > { %1145 = vmatpush1.bf16.msra.mxu0 %v3425_v37  ;;  %1186 = vmatpush1.bf16.msra.mxu1 %v3429_v38 }
 0x1ff   : > { %1146 = vmatprep.subr.bf16.mxu0 %v3435_v39  ;;  %1187 = vmatprep.subr.bf16.mxu1 %v3439_v55 }
 0x202   : > { %1147 = vmatpush1.bf16.msra.mxu0 %v3445_v40  ;;  %1188 = vmatpush1.bf16.msra.mxu1 %v3449_v41 }
 0x203   : > { %1148 = vmatprep.subr.bf16.mxu0 %v3455_v56  ;;  %1189 = vmatprep.subr.bf16.mxu1 %v3459_v57 }
 0x206   : > { %1149 = vmatpush1.bf16.msra.mxu0 %v3467_v45  ;;  %1190 = vmatpush1.bf16.msra.mxu1 %v3471_v46 }
 0x207   : > { %1150 = vmatprep.subr.bf16.mxu0 %v3477_v47  ;;  %1191 = vmatprep.subr.bf16.mxu1 %v3481_v60 }
 0x20a   : > { %1151 = vmatpush1.bf16.msra.mxu0 %v3487_v48  ;;  %1192 = vmatpush1.bf16.msra.mxu1 %v3491_v49 }
 0x20b   : > { %1152 = vmatprep.subr.bf16.mxu0 %v3497_v3  ;;  %1193 = vmatprep.subr.bf16.mxu1 %v3501_v6 }
 0x20e   : > { %1153 = vmatpush1.bf16.msra.mxu0 %v3509_v54  ;;  %1194 = vmatpush1.bf16.msra.mxu1 %v3513_v7 }
 0x20f   : > { %1154 = vmatprep.subr.bf16.mxu0 %v3519_v9  ;;  %1195 = vmatprep.subr.bf16.mxu1 %v3523_v12 }
 0x212   : > { %1155 = vmatpush1.bf16.msra.mxu0 %v3529_v13  ;;  %1196 = vmatpush1.bf16.msra.mxu1 %v3533_v14 }
 0x215   : > { %1173 = vmatmul.mubr.bf16.vlgmr.msra.gmra.mrb[20].mxu0 %v1139_v8  ;;  %1214 = vmatmul.mubr.bf16.vlgmr.msra.gmra.mrb[20].mxu1 %v1139_v8 }
 0x2e8   : > { %v1174_v15 = vpop.f32.mrb[20].mxu0  ;;  %v1215_v22 = vpop.f32.mrb[20].mxu1 }
 0x2e9   : > { %v1222_v16 = vadd.f32 %v1174_v15, %v1135_v10  ;;  %v1176_v17 = vpop.f32.mrb[21].mxu0  ;;  %v1217_v23 = vpop.f32.mrb[21].mxu1  ;;  %v1224_v42 = vadd.f32 %v1215_v22, %v1137_v43 }
 0x2ea   : > { %v1223_v18 = vadd.f32 %v1176_v17, %v1136_v11  ;;  %v1178_v24 = vpop.f32.mrb[22].mxu0  ;;  %v1219_v19 = vpop.f32.mrb[22].mxu1  ;;  %v1225_v36 = vadd.f32 %v1217_v23, %v1138_v34 }
 0x2eb   : > { %v2316_v20 = vmul.f32 -1.442695, %v1222_v16  ;;  %v1179_v26 = vpop.f32.mrb[23].mxu0  ;;  %v1220_v21 = vpop.f32.mrb[23].mxu1 }
 0x2ec   : > { %v2317_v61 = vmul.f32 -1.442695, %v1223_v18  ;;  %v2318_v35 = vmul.f32 -1.442695, %v1225_v36 }
 0x2ed   : > { %2503 = vpow2.f32 %v2316_v20 }
 0x2ee   : > { %2505 = vpow2.f32 %v2317_v61 }
 0x2ef   : > { %2507 = vpow2.f32 %v2318_v35 }
 0x2f0   : > { %2509 = vtanh.f32 %v1224_v42 }
 0x2f7   : > { %v2504_v44 = vpop.eup %2503 }
 0x2f8   : > { %v2506_v58 = vpop.eup %2505  ;;  %v1229_v59 = vadd.f32 1.0, %v2504_v44 }
 0x2f9   : > { %v1235_v50 = vadd.f32 1.0, %v2506_v58  ;;  %v2508_v51 = vpop.eup %2507 }
 0x2fa   : > { %2511 = vrcp.f32 %v1229_v59  ;;  %v2510_v0 = vpop.eup %2509  ;;  %v1242_v5 = vadd.f32 1.0, %v2508_v51 }
 0x2fb   : > { %2513 = vrcp.f32 %v1235_v50 }
 0x2fc   : > { %2515 = vrcp.f32 %v1242_v5 }
 0x304   : > { %v2512_v1 = vpop.eup %2511 }
 0x305   : > { %v2514_v52 = vpop.eup %2513  ;;  %v1246_v53 = vmul.f32 %v2512_v1, %v2510_v0 }
 0x306   : > { %v1245_v8 = vmul.f32 %v2514_v52, %v3599_v4  ;;  %v2516_v11 = vpop.eup %2515 }
 0x308   : > { %v3640_v10 = vadd.f32 %v1246_v53, %v1245_v8 }
 0x30a   : > { %2517 = vtanh.f32 %v3640_v10 }
 0x30f   : > { %1252 = sbr.rel (%p2315_p4) target bundleno = 792 (0x318), region = 72 }
 0x314   : > { %v2518_v15 = vpop.eup %2517 }
 0x315   : > { %v1249_v22 = vmul.f32 %v2518_v15, %v2516_v11 }
 0x317   : > { %1254 = vst [vmem:[#allocation2 + $0x8] sm:$0xff] %v1249_v22 }
 0x318 PF: > { %1261 = vmatprep.subr.bf16.mxu0 %v3375_v25  ;;  %1302 = vmatprep.subr.bf16.mxu1 %v3379_v27  ;;  %v1260_v4 = vpack.c.bf16 %v1249_v22, %v1249_v22  ;;  %v1256_v16 = vld [vmem:[#allocation3 + $0x40] sm:$0xff]  ;;  %v1257_v17 = vld [vmem:[#allocation3 + $0x48] sm:$0xff]  ;;  %v1259_v42 = vld [vmem:[#allocation3 + $0x58] sm:$0xff] }
 0x319   : > { %1262 = vmatpush1.bf16.msra.mxu0 %v3383_v28  ;;  %1303 = vmatpush1.bf16.msra.mxu1 %v3387_v29  ;;  %v1258_v58 = vld [vmem:[#allocation3 + $0x50] sm:$0xff] }
 0x31a   : > { %1263 = vmatprep.subr.bf16.mxu0 %v3393_v30  ;;  %1304 = vmatprep.subr.bf16.mxu1 %v3397_v31 }
 0x31b   : > { %1293 = vmatprep.mubr.bf16.mxu0 %v2843_v2  ;;  %1334 = vmatprep.mubr.bf16.mxu1 %v2843_v2 }
 0x31d   : > { %1264 = vmatpush1.bf16.msra.mxu0 %v3403_v32  ;;  %1305 = vmatpush1.bf16.msra.mxu1 %v3407_v33 }
 0x31e   : > { %1265 = vmatprep.subr.bf16.mxu0 %v3413_v62  ;;  %1306 = vmatprep.subr.bf16.mxu1 %v3417_v63 }
 0x321   : > { %1266 = vmatpush1.bf16.msra.mxu0 %v3425_v37  ;;  %1307 = vmatpush1.bf16.msra.mxu1 %v3429_v38 }
 0x322   : > { %1267 = vmatprep.subr.bf16.mxu0 %v3435_v39  ;;  %1308 = vmatprep.subr.bf16.mxu1 %v3439_v55 }
 0x325   : > { %1268 = vmatpush1.bf16.msra.mxu0 %v3445_v40  ;;  %1309 = vmatpush1.bf16.msra.mxu1 %v3449_v41 }
 0x326   : > { %1269 = vmatprep.subr.bf16.mxu0 %v3455_v56  ;;  %1310 = vmatprep.subr.bf16.mxu1 %v3459_v57 }
 0x329   : > { %1270 = vmatpush1.bf16.msra.mxu0 %v3467_v45  ;;  %1311 = vmatpush1.bf16.msra.mxu1 %v3471_v46 }
 0x32a   : > { %1271 = vmatprep.subr.bf16.mxu0 %v3477_v47  ;;  %1312 = vmatprep.subr.bf16.mxu1 %v3481_v60 }
 0x32d   : > { %1272 = vmatpush1.bf16.msra.mxu0 %v3487_v48  ;;  %1313 = vmatpush1.bf16.msra.mxu1 %v3491_v49 }
 0x32e   : > { %1273 = vmatprep.subr.bf16.mxu0 %v3497_v3  ;;  %1314 = vmatprep.subr.bf16.mxu1 %v3501_v6 }
 0x331   : > { %1274 = vmatpush1.bf16.msra.mxu0 %v3509_v54  ;;  %1315 = vmatpush1.bf16.msra.mxu1 %v3513_v7 }
 0x332   : > { %1275 = vmatprep.subr.bf16.mxu0 %v3519_v9  ;;  %1316 = vmatprep.subr.bf16.mxu1 %v3523_v12 }
 0x335   : > { %1276 = vmatpush1.bf16.msra.mxu0 %v3529_v13  ;;  %1317 = vmatpush1.bf16.msra.mxu1 %v3533_v14 }
 0x338   : > { %1294 = vmatmul.mubr.bf16.vlgmr.msra.gmra.mrb[24].mxu0 %v1260_v4  ;;  %1335 = vmatmul.mubr.bf16.vlgmr.msra.gmra.mrb[24].mxu1 %v1260_v4 }
 0x40b   : > { %v1295_v23 = vpop.f32.mrb[24].mxu0  ;;  %v1336_v18 = vpop.f32.mrb[24].mxu1 }
 0x40c   : > { %v1343_v24 = vadd.f32 %v1295_v23, %v1256_v16  ;;  %v1297_v19 = vpop.f32.mrb[25].mxu0  ;;  %v1338_v20 = vpop.f32.mrb[25].mxu1  ;;  %v1345_v50 = vadd.f32 %v1336_v18, %v1258_v58 }
 0x40d   : > { %v1344_v26 = vadd.f32 %v1297_v19, %v1257_v17  ;;  %v1299_v21 = vpop.f32.mrb[26].mxu0  ;;  %v1340_v61 = vpop.f32.mrb[26].mxu1  ;;  %v1346_v44 = vadd.f32 %v1338_v20, %v1259_v42 }
 0x40e   : > { %v2320_v34 = vmul.f32 -1.442695, %v1343_v24  ;;  %v1300_v36 = vpop.f32.mrb[27].mxu0  ;;  %v1341_v43 = vpop.f32.mrb[27].mxu1 }
 0x40f   : > { %v2321_v35 = vmul.f32 -1.442695, %v1344_v26  ;;  %v2322_v59 = vmul.f32 -1.442695, %v1346_v44 }
 0x410   : > { %2519 = vpow2.f32 %v2320_v34 }
 0x411   : > { %2521 = vpow2.f32 %v2321_v35 }
 0x412   : > { %2523 = vpow2.f32 %v2322_v59 }
 0x413   : > { %2525 = vtanh.f32 %v1345_v50 }
 0x41a   : > { %v2520_v51 = vpop.eup %2519 }
 0x41b   : > { %v2522_v0 = vpop.eup %2521  ;;  %v1350_v1 = vadd.f32 1.0, %v2520_v51 }
 0x41c   : > { %v1356_v5 = vadd.f32 1.0, %v2522_v0  ;;  %v2524_v52 = vpop.eup %2523 }
 0x41d   : > { %2527 = vrcp.f32 %v1350_v1  ;;  %v2526_v53 = vpop.eup %2525  ;;  %v1363_v11 = vadd.f32 1.0, %v2524_v52 }
 0x41e   : > { %2529 = vrcp.f32 %v1356_v5 }
 0x41f   : > { %2531 = vrcp.f32 %v1363_v11 }
 0x427   : > { %v2528_v8 = vpop.eup %2527 }
 0x428   : > { %v2530_v15 = vpop.eup %2529  ;;  %v1367_v22 = vmul.f32 %v2528_v8, %v2526_v53 }
 0x429   : > { %v1366_v4 = vmul.f32 %v2530_v15, %v3640_v10  ;;  %v2532_v17 = vpop.eup %2531 }
 0x42b   : > { %v3680_v16 = vadd.f32 %v1367_v22, %v1366_v4 }
 0x42d   : > { %2533 = vtanh.f32 %v3680_v16 }
 0x432   : > { %1373 = sbr.rel (%p2315_p4) target bundleno = 1083 (0x43b), region = 76 }
 0x437   : > { %v2534_v23 = vpop.eup %2533 }
 0x438   : > { %v1370_v18 = vmul.f32 %v2534_v23, %v2532_v17 }
 0x43a   : > { %1375 = vst [vmem:[#allocation2 + $0x10] sm:$0xff] %v1370_v18 }
 0x43b PF: > { %1382 = vmatprep.subr.bf16.mxu0 %v3375_v25  ;;  %1423 = vmatprep.subr.bf16.mxu1 %v3379_v27  ;;  %v1381_v10 = vpack.c.bf16 %v1370_v18, %v1370_v18  ;;  %v1377_v24 = vld [vmem:[#allocation3 + $0x60] sm:$0xff]  ;;  %v1378_v19 = vld [vmem:[#allocation3 + $0x68] sm:$0xff]  ;;  %v1380_v50 = vld [vmem:[#allocation3 + $0x78] sm:$0xff] }
 0x43c   : > { %1383 = vmatpush1.bf16.msra.mxu0 %v3383_v28  ;;  %1424 = vmatpush1.bf16.msra.mxu1 %v3387_v29  ;;  %v1379_v0 = vld [vmem:[#allocation3 + $0x70] sm:$0xff] }
 0x43d   : > { %1384 = vmatprep.subr.bf16.mxu0 %v3393_v30  ;;  %1425 = vmatprep.subr.bf16.mxu1 %v3397_v31 }
 0x43e   : > { %1414 = vmatprep.mubr.bf16.mxu0 %v2843_v2  ;;  %1455 = vmatprep.mubr.bf16.mxu1 %v2843_v2 }
 0x440   : > { %1385 = vmatpush1.bf16.msra.mxu0 %v3403_v32  ;;  %1426 = vmatpush1.bf16.msra.mxu1 %v3407_v33 }
 0x441   : > { %1386 = vmatprep.subr.bf16.mxu0 %v3413_v62  ;;  %1427 = vmatprep.subr.bf16.mxu1 %v3417_v63 }
 0x444   : > { %1387 = vmatpush1.bf16.msra.mxu0 %v3425_v37  ;;  %1428 = vmatpush1.bf16.msra.mxu1 %v3429_v38 }
 0x445   : > { %1388 = vmatprep.subr.bf16.mxu0 %v3435_v39  ;;  %1429 = vmatprep.subr.bf16.mxu1 %v3439_v55 }
 0x448   : > { %1389 = vmatpush1.bf16.msra.mxu0 %v3445_v40  ;;  %1430 = vmatpush1.bf16.msra.mxu1 %v3449_v41 }
 0x449   : > { %1390 = vmatprep.subr.bf16.mxu0 %v3455_v56  ;;  %1431 = vmatprep.subr.bf16.mxu1 %v3459_v57 }
 0x44c   : > { %1391 = vmatpush1.bf16.msra.mxu0 %v3467_v45  ;;  %1432 = vmatpush1.bf16.msra.mxu1 %v3471_v46 }
 0x44d   : > { %1392 = vmatprep.subr.bf16.mxu0 %v3477_v47  ;;  %1433 = vmatprep.subr.bf16.mxu1 %v3481_v60 }
 0x450   : > { %1393 = vmatpush1.bf16.msra.mxu0 %v3487_v48  ;;  %1434 = vmatpush1.bf16.msra.mxu1 %v3491_v49 }
 0x451   : > { %1394 = vmatprep.subr.bf16.mxu0 %v3497_v3  ;;  %1435 = vmatprep.subr.bf16.mxu1 %v3501_v6 }
 0x454   : > { %1395 = vmatpush1.bf16.msra.mxu0 %v3509_v54  ;;  %1436 = vmatpush1.bf16.msra.mxu1 %v3513_v7 }
 0x455   : > { %1396 = vmatprep.subr.bf16.mxu0 %v3519_v9  ;;  %1437 = vmatprep.subr.bf16.mxu1 %v3523_v12 }
 0x458   : > { %1397 = vmatpush1.bf16.msra.mxu0 %v3529_v13  ;;  %1438 = vmatpush1.bf16.msra.mxu1 %v3533_v14 }
 0x45b   : > { %1415 = vmatmul.mubr.bf16.vlgmr.msra.gmra.mrb[28].mxu0 %v1381_v10  ;;  %1456 = vmatmul.mubr.bf16.vlgmr.msra.gmra.mrb[28].mxu1 %v1381_v10 }
 0x52e   : > { %v1416_v20 = vpop.f32.mrb[28].mxu0  ;;  %v1457_v26 = vpop.f32.mrb[28].mxu1 }
 0x52f   : > { %v1464_v21 = vadd.f32 %v1416_v20, %v1377_v24  ;;  %v1418_v61 = vpop.f32.mrb[29].mxu0  ;;  %v1459_v34 = vpop.f32.mrb[29].mxu1  ;;  %v1466_v5 = vadd.f32 %v1457_v26, %v1379_v0 }
 0x530   : > { %v1465_v36 = vadd.f32 %v1418_v61, %v1378_v19  ;;  %v1420_v43 = vpop.f32.mrb[30].mxu0  ;;  %v1461_v35 = vpop.f32.mrb[30].mxu1  ;;  %v1467_v51 = vadd.f32 %v1459_v34, %v1380_v50 }
 0x531   : > { %v2324_v42 = vmul.f32 -1.442695, %v1464_v21  ;;  %v1421_v44 = vpop.f32.mrb[31].mxu0  ;;  %v1462_v58 = vpop.f32.mrb[31].mxu1 }
 0x532   : > { %v2325_v59 = vmul.f32 -1.442695, %v1465_v36  ;;  %v2326_v1 = vmul.f32 -1.442695, %v1467_v51 }
 0x533   : > { %2535 = vpow2.f32 %v2324_v42 }
 0x534   : > { %2537 = vpow2.f32 %v2325_v59 }
 0x535   : > { %2539 = vpow2.f32 %v2326_v1 }
 0x536   : > { %2541 = vtanh.f32 %v1466_v5 }
 0x53d   : > { %v2536_v52 = vpop.eup %2535 }
 0x53e   : > { %v2538_v53 = vpop.eup %2537  ;;  %v1471_v8 = vadd.f32 1.0, %v2536_v52 }
 0x53f   : > { %v1477_v11 = vadd.f32 1.0, %v2538_v53  ;;  %v2540_v15 = vpop.eup %2539 }
 0x540   : > { %2543 = vrcp.f32 %v1471_v8  ;;  %v2542_v22 = vpop.eup %2541  ;;  %v1484_v17 = vadd.f32 1.0, %v2540_v15 }
 0x541   : > { %2545 = vrcp.f32 %v1477_v11 }
 0x542   : > { %2547 = vrcp.f32 %v1484_v17 }
 0x54a   : > { %v2544_v4 = vpop.eup %2543 }
 0x54b   : > { %v2546_v23 = vpop.eup %2545  ;;  %v1488_v18 = vmul.f32 %v2544_v4, %v2542_v22 }
 0x54c   : > { %v1487_v10 = vmul.f32 %v2546_v23, %v3680_v16  ;;  %v2548_v19 = vpop.eup %2547 }
 0x54e   : > { %v3720_v24 = vadd.f32 %v1488_v18, %v1487_v10 }
 0x550   : > { %2549 = vtanh.f32 %v3720_v24 }
 0x555   : > { %1494 = sbr.rel (%p2315_p4) target bundleno = 1374 (0x55e), region = 80 }
 0x55a   : > { %v2550_v20 = vpop.eup %2549 }
 0x55b   : > { %v1491_v26 = vmul.f32 %v2550_v20, %v2548_v19 }
 0x55d   : > { %1496 = vst [vmem:[#allocation2 + $0x18] sm:$0xff] %v1491_v26 }
 0x55e PF: > { %1503 = vmatprep.subr.bf16.mxu0 %v3375_v25  ;;  %1544 = vmatprep.subr.bf16.mxu1 %v3379_v27  ;;  %v1502_v16 = vpack.c.bf16 %v1491_v26, %v1491_v26  ;;  %v1498_v21 = vld [vmem:[#allocation3 + $0x80] sm:$0xff]  ;;  %v1499_v61 = vld [vmem:[#allocation3 + $0x88] sm:$0xff]  ;;  %v1501_v5 = vld [vmem:[#allocation3 + $0x98] sm:$0xff] }
 0x55f   : > { %1504 = vmatpush1.bf16.msra.mxu0 %v3383_v28  ;;  %1545 = vmatpush1.bf16.msra.mxu1 %v3387_v29  ;;  %v1500_v53 = vld [vmem:[#allocation3 + $0x90] sm:$0xff] }
 0x560   : > { %1505 = vmatprep.subr.bf16.mxu0 %v3393_v30  ;;  %1546 = vmatprep.subr.bf16.mxu1 %v3397_v31 }
 0x561   : > { %1535 = vmatprep.mubr.bf16.mxu0 %v2843_v2  ;;  %1576 = vmatprep.mubr.bf16.mxu1 %v2843_v2 }
 0x563   : > { %1506 = vmatpush1.bf16.msra.mxu0 %v3403_v32  ;;  %1547 = vmatpush1.bf16.msra.mxu1 %v3407_v33 }
 0x564   : > { %1507 = vmatprep.subr.bf16.mxu0 %v3413_v62  ;;  %1548 = vmatprep.subr.bf16.mxu1 %v3417_v63 }
 0x567   : > { %1508 = vmatpush1.bf16.msra.mxu0 %v3425_v37  ;;  %1549 = vmatpush1.bf16.msra.mxu1 %v3429_v38 }
 0x568   : > { %1509 = vmatprep.subr.bf16.mxu0 %v3435_v39  ;;  %1550 = vmatprep.subr.bf16.mxu1 %v3439_v55 }
 0x56b   : > { %1510 = vmatpush1.bf16.msra.mxu0 %v3445_v40  ;;  %1551 = vmatpush1.bf16.msra.mxu1 %v3449_v41 }
 0x56c   : > { %1511 = vmatprep.subr.bf16.mxu0 %v3455_v56  ;;  %1552 = vmatprep.subr.bf16.mxu1 %v3459_v57 }
 0x56f   : > { %1512 = vmatpush1.bf16.msra.mxu0 %v3467_v45  ;;  %1553 = vmatpush1.bf16.msra.mxu1 %v3471_v46 }
 0x570   : > { %1513 = vmatprep.subr.bf16.mxu0 %v3477_v47  ;;  %1554 = vmatprep.subr.bf16.mxu1 %v3481_v60 }
 0x573   : > { %1514 = vmatpush1.bf16.msra.mxu0 %v3487_v48  ;;  %1555 = vmatpush1.bf16.msra.mxu1 %v3491_v49 }
 0x574   : > { %1515 = vmatprep.subr.bf16.mxu0 %v3497_v3  ;;  %1556 = vmatprep.subr.bf16.mxu1 %v3501_v6 }
 0x577   : > { %1516 = vmatpush1.bf16.msra.mxu0 %v3509_v54  ;;  %1557 = vmatpush1.bf16.msra.mxu1 %v3513_v7 }
 0x578   : > { %1517 = vmatprep.subr.bf16.mxu0 %v3519_v9  ;;  %1558 = vmatprep.subr.bf16.mxu1 %v3523_v12 }
 0x57b   : > { %1518 = vmatpush1.bf16.msra.mxu0 %v3529_v13  ;;  %1559 = vmatpush1.bf16.msra.mxu1 %v3533_v14 }
 0x57e   : > { %1536 = vmatmul.mubr.bf16.vlgmr.msra.gmra.mrb[32].mxu0 %v1502_v16  ;;  %1577 = vmatmul.mubr.bf16.vlgmr.msra.gmra.mrb[32].mxu1 %v1502_v16 }
 0x651   : > { %v1537_v34 = vpop.f32.mrb[32].mxu0  ;;  %v1578_v36 = vpop.f32.mrb[32].mxu1 }
 0x652   : > { %v1585_v43 = vadd.f32 %v1537_v34, %v1498_v21  ;;  %v1539_v35 = vpop.f32.mrb[33].mxu0  ;;  %v1580_v42 = vpop.f32.mrb[33].mxu1  ;;  %v1587_v11 = vadd.f32 %v1578_v36, %v1500_v53 }
 0x653   : > { %v1586_v44 = vadd.f32 %v1539_v35, %v1499_v61  ;;  %v1541_v58 = vpop.f32.mrb[34].mxu0  ;;  %v1582_v59 = vpop.f32.mrb[34].mxu1  ;;  %v1588_v52 = vadd.f32 %v1580_v42, %v1501_v5 }
 0x654   : > { %v2328_v50 = vmul.f32 -1.442695, %v1585_v43  ;;  %v1542_v51 = vpop.f32.mrb[35].mxu0  ;;  %v1583_v0 = vpop.f32.mrb[35].mxu1 }
 0x655   : > { %v2329_v1 = vmul.f32 -1.442695, %v1586_v44  ;;  %v2330_v8 = vmul.f32 -1.442695, %v1588_v52 }
 0x656   : > { %2551 = vpow2.f32 %v2328_v50 }
 0x657   : > { %2553 = vpow2.f32 %v2329_v1 }
 0x658   : > { %2555 = vpow2.f32 %v2330_v8 }
 0x659   : > { %2557 = vtanh.f32 %v1587_v11 }
 0x660   : > { %v2552_v15 = vpop.eup %2551 }
 0x661   : > { %v2554_v22 = vpop.eup %2553  ;;  %v1592_v4 = vadd.f32 1.0, %v2552_v15 }
 0x662   : > { %v1598_v17 = vadd.f32 1.0, %v2554_v22  ;;  %v2556_v23 = vpop.eup %2555 }
 0x663   : > { %2559 = vrcp.f32 %v1592_v4  ;;  %v2558_v18 = vpop.eup %2557  ;;  %v1605_v19 = vadd.f32 1.0, %v2556_v23 }
 0x664   : > { %2561 = vrcp.f32 %v1598_v17 }
 0x665   : > { %2563 = vrcp.f32 %v1605_v19 }
 0x66d   : > { %v2560_v10 = vpop.eup %2559 }
 0x66e   : > { %v2562_v20 = vpop.eup %2561  ;;  %v1609_v26 = vmul.f32 %v2560_v10, %v2558_v18 }
 0x66f   : > { %v1608_v16 = vmul.f32 %v2562_v20, %v3720_v24  ;;  %v2564_v61 = vpop.eup %2563 }
 0x671   : > { %v3760_v21 = vadd.f32 %v1609_v26, %v1608_v16 }
 0x673   : > { %2565 = vtanh.f32 %v3760_v21 }
 0x678   : > { %1615 = sbr.rel (%p2315_p4) target bundleno = 1665 (0x681), region = 84 }
 0x67d   : > { %v2566_v34 = vpop.eup %2565 }
 0x67e   : > { %v1612_v36 = vmul.f32 %v2566_v34, %v2564_v61 }
 0x680   : > { %1617 = vst [vmem:[#allocation2 + $0x20] sm:$0xff] %v1612_v36 }
 0x681 PF: > { %1624 = vmatprep.subr.bf16.mxu0 %v3375_v25  ;;  %1665 = vmatprep.subr.bf16.mxu1 %v3379_v27  ;;  %v1623_v24 = vpack.c.bf16 %v1612_v36, %v1612_v36  ;;  %v1619_v43 = vld [vmem:[#allocation3 + $0xa0] sm:$0xff]  ;;  %v1620_v35 = vld [vmem:[#allocation3 + $0xa8] sm:$0xff]  ;;  %v1622_v11 = vld [vmem:[#allocation3 + $0xb8] sm:$0xff] }
 0x682   : > { %1625 = vmatpush1.bf16.msra.mxu0 %v3383_v28  ;;  %1666 = vmatpush1.bf16.msra.mxu1 %v3387_v29  ;;  %v1621_v22 = vld [vmem:[#allocation3 + $0xb0] sm:$0xff] }
 0x683   : > { %1626 = vmatprep.subr.bf16.mxu0 %v3393_v30  ;;  %1667 = vmatprep.subr.bf16.mxu1 %v3397_v31 }
 0x684   : > { %1656 = vmatprep.mubr.bf16.mxu0 %v2843_v2  ;;  %1697 = vmatprep.mubr.bf16.mxu1 %v2843_v2 }
 0x686   : > { %1627 = vmatpush1.bf16.msra.mxu0 %v3403_v32  ;;  %1668 = vmatpush1.bf16.msra.mxu1 %v3407_v33 }
 0x687   : > { %1628 = vmatprep.subr.bf16.mxu0 %v3413_v62  ;;  %1669 = vmatprep.subr.bf16.mxu1 %v3417_v63 }
 0x68a   : > { %1629 = vmatpush1.bf16.msra.mxu0 %v3425_v37  ;;  %1670 = vmatpush1.bf16.msra.mxu1 %v3429_v38 }
 0x68b   : > { %1630 = vmatprep.subr.bf16.mxu0 %v3435_v39  ;;  %1671 = vmatprep.subr.bf16.mxu1 %v3439_v55 }
 0x68e   : > { %1631 = vmatpush1.bf16.msra.mxu0 %v3445_v40  ;;  %1672 = vmatpush1.bf16.msra.mxu1 %v3449_v41 }
 0x68f   : > { %1632 = vmatprep.subr.bf16.mxu0 %v3455_v56  ;;  %1673 = vmatprep.subr.bf16.mxu1 %v3459_v57 }
 0x692   : > { %1633 = vmatpush1.bf16.msra.mxu0 %v3467_v45  ;;  %1674 = vmatpush1.bf16.msra.mxu1 %v3471_v46 }
 0x693   : > { %1634 = vmatprep.subr.bf16.mxu0 %v3477_v47  ;;  %1675 = vmatprep.subr.bf16.mxu1 %v3481_v60 }
 0x696   : > { %1635 = vmatpush1.bf16.msra.mxu0 %v3487_v48  ;;  %1676 = vmatpush1.bf16.msra.mxu1 %v3491_v49 }
 0x697   : > { %1636 = vmatprep.subr.bf16.mxu0 %v3497_v3  ;;  %1677 = vmatprep.subr.bf16.mxu1 %v3501_v6 }
 0x69a   : > { %1637 = vmatpush1.bf16.msra.mxu0 %v3509_v54  ;;  %1678 = vmatpush1.bf16.msra.mxu1 %v3513_v7 }
 0x69b   : > { %1638 = vmatprep.subr.bf16.mxu0 %v3519_v9  ;;  %1679 = vmatprep.subr.bf16.mxu1 %v3523_v12 }
 0x69e   : > { %1639 = vmatpush1.bf16.msra.mxu0 %v3529_v13  ;;  %1680 = vmatpush1.bf16.msra.mxu1 %v3533_v14 }
 0x6a1   : > { %1657 = vmatmul.mubr.bf16.vlgmr.msra.gmra.mrb[36].mxu0 %v1623_v24  ;;  %1698 = vmatmul.mubr.bf16.vlgmr.msra.gmra.mrb[36].mxu1 %v1623_v24 }
 0x774   : > { %v1658_v42 = vpop.f32.mrb[36].mxu0  ;;  %v1699_v44 = vpop.f32.mrb[36].mxu1 }
 0x775   : > { %v1706_v58 = vadd.f32 %v1658_v42, %v1619_v43  ;;  %v1660_v59 = vpop.f32.mrb[37].mxu0  ;;  %v1701_v50 = vpop.f32.mrb[37].mxu1  ;;  %v1708_v17 = vadd.f32 %v1699_v44, %v1621_v22 }
 0x776   : > { %v1707_v51 = vadd.f32 %v1660_v59, %v1620_v35  ;;  %v1662_v0 = vpop.f32.mrb[38].mxu0  ;;  %v1703_v1 = vpop.f32.mrb[38].mxu1  ;;  %v1709_v15 = vadd.f32 %v1701_v50, %v1622_v11 }
 0x777   : > { %v2332_v5 = vmul.f32 -1.442695, %v1706_v58  ;;  %v1663_v52 = vpop.f32.mrb[39].mxu0  ;;  %v1704_v53 = vpop.f32.mrb[39].mxu1 }
 0x778   : > { %v2333_v8 = vmul.f32 -1.442695, %v1707_v51  ;;  %v2334_v4 = vmul.f32 -1.442695, %v1709_v15 }
 0x779   : > { %2567 = vpow2.f32 %v2332_v5 }
 0x77a   : > { %2569 = vpow2.f32 %v2333_v8 }
 0x77b   : > { %2571 = vpow2.f32 %v2334_v4 }
 0x77c   : > { %2573 = vtanh.f32 %v1708_v17 }
 0x783   : > { %v2568_v23 = vpop.eup %2567 }
 0x784   : > { %v2570_v18 = vpop.eup %2569  ;;  %v1713_v10 = vadd.f32 1.0, %v2568_v23 }
 0x785   : > { %v1719_v19 = vadd.f32 1.0, %v2570_v18  ;;  %v2572_v20 = vpop.eup %2571 }
 0x786   : > { %2575 = vrcp.f32 %v1713_v10  ;;  %v2574_v26 = vpop.eup %2573  ;;  %v1726_v61 = vadd.f32 1.0, %v2572_v20 }
 0x787   : > { %2577 = vrcp.f32 %v1719_v19 }
 0x788   : > { %2579 = vrcp.f32 %v1726_v61 }
 0x790   : > { %v2576_v16 = vpop.eup %2575 }
 0x791   : > { %v2578_v34 = vpop.eup %2577  ;;  %v1730_v36 = vmul.f32 %v2576_v16, %v2574_v26 }
 0x792   : > { %v1729_v24 = vmul.f32 %v2578_v34, %v3760_v21  ;;  %v2580_v35 = vpop.eup %2579 }
 0x794   : > { %v3800_v43 = vadd.f32 %v1730_v36, %v1729_v24 }
 0x796   : > { %2581 = vtanh.f32 %v3800_v43 }
 0x79b   : > { %1736 = sbr.rel (%p2315_p4) target bundleno = 1956 (0x7a4), region = 88 }
 0x7a0   : > { %v2582_v42 = vpop.eup %2581 }
 0x7a1   : > { %v1733_v44 = vmul.f32 %v2582_v42, %v2580_v35 }
 0x7a3   : > { %1738 = vst [vmem:[#allocation2 + $0x28] sm:$0xff] %v1733_v44 }
 0x7a4 PF: > { %1745 = vmatprep.subr.bf16.mxu0 %v3375_v25  ;;  %1786 = vmatprep.subr.bf16.mxu1 %v3379_v27  ;;  %v1744_v21 = vpack.c.bf16 %v1733_v44, %v1733_v44  ;;  %v1740_v58 = vld [vmem:[#allocation3 + $0xc0] sm:$0xff]  ;;  %v1741_v59 = vld [vmem:[#allocation3 + $0xc8] sm:$0xff]  ;;  %v1743_v17 = vld [vmem:[#allocation3 + $0xd8] sm:$0xff] }
 0x7a5   : > { %1746 = vmatpush1.bf16.msra.mxu0 %v3383_v28  ;;  %1787 = vmatpush1.bf16.msra.mxu1 %v3387_v29  ;;  %v1742_v18 = vld [vmem:[#allocation3 + $0xd0] sm:$0xff] }
 0x7a6   : > { %1747 = vmatprep.subr.bf16.mxu0 %v3393_v30  ;;  %1788 = vmatprep.subr.bf16.mxu1 %v3397_v31 }
 0x7a7   : > { %1777 = vmatprep.mubr.bf16.mxu0 %v2843_v2  ;;  %1818 = vmatprep.mubr.bf16.mxu1 %v2843_v2 }
 0x7a9   : > { %1748 = vmatpush1.bf16.msra.mxu0 %v3403_v32  ;;  %1789 = vmatpush1.bf16.msra.mxu1 %v3407_v33 }
 0x7aa   : > { %1749 = vmatprep.subr.bf16.mxu0 %v3413_v62  ;;  %1790 = vmatprep.subr.bf16.mxu1 %v3417_v63 }
 0x7ad   : > { %1750 = vmatpush1.bf16.msra.mxu0 %v3425_v37  ;;  %1791 = vmatpush1.bf16.msra.mxu1 %v3429_v38 }
 0x7ae   : > { %1751 = vmatprep.subr.bf16.mxu0 %v3435_v39  ;;  %1792 = vmatprep.subr.bf16.mxu1 %v3439_v55 }
 0x7b1   : > { %1752 = vmatpush1.bf16.msra.mxu0 %v3445_v40  ;;  %1793 = vmatpush1.bf16.msra.mxu1 %v3449_v41 }
 0x7b2   : > { %1753 = vmatprep.subr.bf16.mxu0 %v3455_v56  ;;  %1794 = vmatprep.subr.bf16.mxu1 %v3459_v57 }
 0x7b5   : > { %1754 = vmatpush1.bf16.msra.mxu0 %v3467_v45  ;;  %1795 = vmatpush1.bf16.msra.mxu1 %v3471_v46 }
 0x7b6   : > { %1755 = vmatprep.subr.bf16.mxu0 %v3477_v47  ;;  %1796 = vmatprep.subr.bf16.mxu1 %v3481_v60 }
 0x7b9   : > { %1756 = vmatpush1.bf16.msra.mxu0 %v3487_v48  ;;  %1797 = vmatpush1.bf16.msra.mxu1 %v3491_v49 }
 0x7ba   : > { %1757 = vmatprep.subr.bf16.mxu0 %v3497_v3  ;;  %1798 = vmatprep.subr.bf16.mxu1 %v3501_v6 }
 0x7bd   : > { %1758 = vmatpush1.bf16.msra.mxu0 %v3509_v54  ;;  %1799 = vmatpush1.bf16.msra.mxu1 %v3513_v7 }
 0x7be   : > { %1759 = vmatprep.subr.bf16.mxu0 %v3519_v9  ;;  %1800 = vmatprep.subr.bf16.mxu1 %v3523_v12 }
 0x7c1   : > { %1760 = vmatpush1.bf16.msra.mxu0 %v3529_v13  ;;  %1801 = vmatpush1.bf16.msra.mxu1 %v3533_v14 }
 0x7c4   : > { %1778 = vmatmul.mubr.bf16.vlgmr.msra.gmra.mrb[40].mxu0 %v1744_v21  ;;  %1819 = vmatmul.mubr.bf16.vlgmr.msra.gmra.mrb[40].mxu1 %v1744_v21 }
 0x897   : > { %v1779_v50 = vpop.f32.mrb[40].mxu0  ;;  %v1820_v51 = vpop.f32.mrb[40].mxu1 }
 0x898   : > { %v1827_v0 = vadd.f32 %v1779_v50, %v1740_v58  ;;  %v1781_v1 = vpop.f32.mrb[41].mxu0  ;;  %v1822_v5 = vpop.f32.mrb[41].mxu1  ;;  %v1829_v19 = vadd.f32 %v1820_v51, %v1742_v18 }
 0x899   : > { %v1828_v52 = vadd.f32 %v1781_v1, %v1741_v59  ;;  %v1783_v53 = vpop.f32.mrb[42].mxu0  ;;  %v1824_v8 = vpop.f32.mrb[42].mxu1  ;;  %v1830_v23 = vadd.f32 %v1822_v5, %v1743_v17 }
 0x89a   : > { %v2336_v11 = vmul.f32 -1.442695, %v1827_v0  ;;  %v1784_v15 = vpop.f32.mrb[43].mxu0  ;;  %v1825_v22 = vpop.f32.mrb[43].mxu1 }
 0x89b   : > { %v2337_v4 = vmul.f32 -1.442695, %v1828_v52  ;;  %v2338_v10 = vmul.f32 -1.442695, %v1830_v23 }
 0x89c   : > { %2583 = vpow2.f32 %v2336_v11 }
 0x89d   : > { %2585 = vpow2.f32 %v2337_v4 }
 0x89e   : > { %2587 = vpow2.f32 %v2338_v10 }
 0x89f   : > { %2589 = vtanh.f32 %v1829_v19 }
 0x8a6   : > { %v2584_v20 = vpop.eup %2583 }
 0x8a7   : > { %v2586_v26 = vpop.eup %2585  ;;  %v1834_v16 = vadd.f32 1.0, %v2584_v20 }
 0x8a8   : > { %v1840_v61 = vadd.f32 1.0, %v2586_v26  ;;  %v2588_v34 = vpop.eup %2587 }
 0x8a9   : > { %2591 = vrcp.f32 %v1834_v16  ;;  %v2590_v36 = vpop.eup %2589  ;;  %v1847_v35 = vadd.f32 1.0, %v2588_v34 }
 0x8aa   : > { %2593 = vrcp.f32 %v1840_v61 }
 0x8ab   : > { %2595 = vrcp.f32 %v1847_v35 }
 0x8b3   : > { %v2592_v24 = vpop.eup %2591 }
 0x8b4   : > { %v2594_v42 = vpop.eup %2593  ;;  %v1851_v44 = vmul.f32 %v2592_v24, %v2590_v36 }
 0x8b5   : > { %v1850_v21 = vmul.f32 %v2594_v42, %v3800_v43  ;;  %v2596_v59 = vpop.eup %2595 }
 0x8b7   : > { %v3840_v58 = vadd.f32 %v1851_v44, %v1850_v21 }
 0x8b9   : > { %2597 = vtanh.f32 %v3840_v58 }
 0x8be   : > { %1857 = sbr.rel (%p2315_p4) target bundleno = 2247 (0x8c7), region = 92 }
 0x8c3   : > { %v2598_v50 = vpop.eup %2597 }
 0x8c4   : > { %v1854_v51 = vmul.f32 %v2598_v50, %v2596_v59 }
 0x8c6   : > { %1859 = vst [vmem:[#allocation2 + $0x30] sm:$0xff] %v1854_v51 }
 0x8c7 PF: > { %1866 = vmatprep.subr.bf16.mxu0 %v3375_v25  ;;  %1907 = vmatprep.subr.bf16.mxu1 %v3379_v27  ;;  %v1861_v25 = vld [vmem:[#allocation3 + $0xe0] sm:$0xff]  ;;  %v1862_v27 = vld [vmem:[#allocation3 + $0xe8] sm:$0xff] }
 0x8c8   : > { %1867 = vmatpush1.bf16.msra.mxu0 %v3383_v28  ;;  %1908 = vmatpush1.bf16.msra.mxu1 %v3387_v29 }
 0x8c9   : > { %1868 = vmatprep.subr.bf16.mxu0 %v3393_v30  ;;  %1909 = vmatprep.subr.bf16.mxu1 %v3397_v31 }
 0x8ca   : > { %1898 = vmatprep.mubr.bf16.mxu0 %v2843_v2  ;;  %1939 = vmatprep.mubr.bf16.mxu1 %v2843_v2  ;;  %v1865_v2 = vpack.c.bf16 %v1854_v51, %v1854_v51 }
 0x8cc   : > { %1869 = vmatpush1.bf16.msra.mxu0 %v3403_v32  ;;  %1910 = vmatpush1.bf16.msra.mxu1 %v3407_v33 }
 0x8cd   : > { %1870 = vmatprep.subr.bf16.mxu0 %v3413_v62  ;;  %1911 = vmatprep.subr.bf16.mxu1 %v3417_v63 }
 0x8d0   : > { %1871 = vmatpush1.bf16.msra.mxu0 %v3425_v37  ;;  %1912 = vmatpush1.bf16.msra.mxu1 %v3429_v38 }
 0x8d1   : > { %1872 = vmatprep.subr.bf16.mxu0 %v3435_v39  ;;  %1913 = vmatprep.subr.bf16.mxu1 %v3439_v55 }
 0x8d4   : > { %1873 = vmatpush1.bf16.msra.mxu0 %v3445_v40  ;;  %1914 = vmatpush1.bf16.msra.mxu1 %v3449_v41  ;;  %v1864_v40 = vld [vmem:[#allocation3 + $0xf8] sm:$0xff] }
 0x8d5   : > { %1874 = vmatprep.subr.bf16.mxu0 %v3455_v56  ;;  %1915 = vmatprep.subr.bf16.mxu1 %v3459_v57  ;;  %v1863_v56 = vld [vmem:[#allocation3 + $0xf0] sm:$0xff] }
 0x8d8   : > { %1875 = vmatpush1.bf16.msra.mxu0 %v3467_v45  ;;  %1916 = vmatpush1.bf16.msra.mxu1 %v3471_v46 }
 0x8d9   : > { %1876 = vmatprep.subr.bf16.mxu0 %v3477_v47  ;;  %1917 = vmatprep.subr.bf16.mxu1 %v3481_v60 }
 0x8dc   : > { %1877 = vmatpush1.bf16.msra.mxu0 %v3487_v48  ;;  %1918 = vmatpush1.bf16.msra.mxu1 %v3491_v49 }
 0x8dd   : > { %1878 = vmatprep.subr.bf16.mxu0 %v3497_v3  ;;  %1919 = vmatprep.subr.bf16.mxu1 %v3501_v6 }
 0x8e0   : > { %1879 = vmatpush1.bf16.msra.mxu0 %v3509_v54  ;;  %1920 = vmatpush1.bf16.msra.mxu1 %v3513_v7 }
 0x8e1   : > { %1880 = vmatprep.subr.bf16.mxu0 %v3519_v9  ;;  %1921 = vmatprep.subr.bf16.mxu1 %v3523_v12 }
 0x8e4   : > { %1881 = vmatpush1.bf16.msra.mxu0 %v3529_v13  ;;  %1922 = vmatpush1.bf16.msra.mxu1 %v3533_v14 }
 0x8e7   : > { %1899 = vmatmul.mubr.bf16.vlgmr.msra.gmra.mrb[44].mxu0 %v1865_v2  ;;  %1940 = vmatmul.mubr.bf16.vlgmr.msra.gmra.mrb[44].mxu1 %v1865_v2 }
 0x9ba   : > { %v1900_v28 = vpop.f32.mrb[44].mxu0  ;;  %v1941_v29 = vpop.f32.mrb[44].mxu1 }
 0x9bb   : > { %v1948_v30 = vadd.f32 %v1900_v28, %v1861_v25  ;;  %v1902_v31 = vpop.f32.mrb[45].mxu0  ;;  %v1943_v32 = vpop.f32.mrb[45].mxu1  ;;  %v1950_v45 = vadd.f32 %v1941_v29, %v1863_v56 }
 0x9bc   : > { %v1949_v33 = vadd.f32 %v1902_v31, %v1862_v27  ;;  %v1904_v62 = vpop.f32.mrb[46].mxu0  ;;  %v1945_v63 = vpop.f32.mrb[46].mxu1  ;;  %v1951_v41 = vadd.f32 %v1943_v32, %v1864_v40 }
 0x9bd   : > { %v2340_v37 = vmul.f32 -1.442695, %v1948_v30  ;;  %v1905_v38 = vpop.f32.mrb[47].mxu0  ;;  %v1946_v39 = vpop.f32.mrb[47].mxu1 }
 0x9be   : > { %v2341_v55 = vmul.f32 -1.442695, %v1949_v33  ;;  %v2342_v57 = vmul.f32 -1.442695, %v1951_v41 }
 0x9bf   : > { %2599 = vpow2.f32 %v2340_v37 }
 0x9c0   : > { %2601 = vpow2.f32 %v2341_v55 }
 0x9c1   : > { %2603 = vpow2.f32 %v2342_v57 }
 0x9c2   : > { %2605 = vtanh.f32 %v1950_v45 }
 0x9c9   : > { %v2600_v46 = vpop.eup %2599 }
 0x9ca   : > { %v2602_v47 = vpop.eup %2601  ;;  %v1955_v60 = vadd.f32 1.0, %v2600_v46 }
 0x9cb   : > { %v1961_v48 = vadd.f32 1.0, %v2602_v47  ;;  %v2604_v49 = vpop.eup %2603 }
 0x9cc   : > { %2607 = vrcp.f32 %v1955_v60  ;;  %v2606_v3 = vpop.eup %2605  ;;  %v1968_v54 = vadd.f32 1.0, %v2604_v49 }
 0x9cd   : > { %2609 = vrcp.f32 %v1961_v48 }
 0x9ce   : > { %2611 = vrcp.f32 %v1968_v54 }
 0x9d6   : > { %v2608_v6 = vpop.eup %2607 }
 0x9d7   : > { %v2610_v7 = vpop.eup %2609  ;;  %v1972_v9 = vmul.f32 %v2608_v6, %v2606_v3 }
 0x9d8   : > { %v1971_v12 = vmul.f32 %v2610_v7, %v3840_v58  ;;  %v2612_v14 = vpop.eup %2611 }
 0x9da   : > { %v1973_v13 = vadd.f32 %v1972_v9, %v1971_v12 }
 0x9dc   : > { %2613 = vtanh.f32 %v1973_v13 }
 0x9e1   : > { %1978 = sbr.rel (%p2315_p4) target bundleno = 2538 (0x9ea), region = 96 }
 0x9e6   : > { %v2614_v43 = vpop.eup %2613 }
 0x9e7   : > { %v1975_v0 = vmul.f32 %v2614_v43, %v2612_v14 }
 0x9e9   : > { %1980 = vst [vmem:[#allocation2 + $0x38] sm:$0xff] %v1975_v0 }
 0x9ea PF: > { %p2344_p9 = scmp.ne.s32.totalorder %s2823_s24, 1 }
 0x9eb   : > { %v2615_v1 = vld [vmem:[#allocation10] sm:$0xff] (!%p2344_p9)   ;;  %v2844_v5 = vmov (!%p2344_p9), 0.0   ;;  %v2616_v52 = vld [vmem:[#allocation10 + $0x8] sm:$0xff] (!%p2344_p9)   ;;  %vm2845_vm0 = vmmov (!%p2344_p9), 0   ;;  %v2617_v53 = vld [vmem:[#allocation10 + $0x10] sm:$0xff] (!%p2344_p9)   ;;  %v1985_v17 = vpack.c.bf16 (!%p2344_p9), %v1975_v0, %v1975_v0 }
 0x9ec   : > { %1984 = sbr.rel (%p2344_p9) target bundleno = 2813 (0xafd), region = 100  ;;  %2370 = vmatprep.subr.bf16.mxu0 (!%p2344_p9), %v2844_v5  ;;  %2386 = vmatprep.mubr.msk.bf16.mxu0 (!%p2344_p9), %vm2845_vm0, %v2844_v5  ;;  %v2618_v8 = vld [vmem:[#allocation10 + $0x18] sm:$0xff] (!%p2344_p9)   ;;  %v2619_v11 = vld [vmem:[#allocation10 + $0x20] sm:$0xff] (!%p2344_p9)   ;;  %v2620_v15 = vld [vmem:[#allocation10 + $0x28] sm:$0xff] (!%p2344_p9)  }
 0x9ed   : > { %2371 = vmatpush3.bf16.msra.mxu0 (!%p2344_p9), %v2615_v1  ;;  %v2621_v22 = vld [vmem:[#allocation10 + $0x30] sm:$0xff] (!%p2344_p9)   ;;  %v2622_v4 = vld [vmem:[#allocation10 + $0x38] sm:$0xff] (!%p2344_p9)   ;;  %v2345_v23 = vld [vmem:[%s3932_s5] ss:$0 sm:$0xff] (!%p2344_p9) }
 0x9ee   : > { %2372 = vmatprep.subr.bf16.mxu0 (!%p2344_p9), %v2844_v5 }
 0x9f1   : > { %2373 = vmatpush3.bf16.msra.mxu0 (!%p2344_p9), %v2616_v52 }
 0x9f2   : > { %2374 = vmatprep.subr.bf16.mxu0 (!%p2344_p9), %v2844_v5 }
 0x9f5   : > { %2375 = vmatpush3.bf16.msra.mxu0 %v2617_v53 }
 0x9f6   : > { %2376 = vmatprep.subr.bf16.mxu0 %v2844_v5 }
 0x9f9   : > { %2377 = vmatpush3.bf16.msra.mxu0 %v2618_v8 }
 0x9fa   : > { %2378 = vmatprep.subr.bf16.mxu0 %v2844_v5 }
 0x9fd   : > { %2379 = vmatpush3.bf16.msra.mxu0 %v2619_v11 }
 0x9fe   : > { %2380 = vmatprep.subr.bf16.mxu0 %v2844_v5 }
 0xa01   : > { %2381 = vmatpush3.bf16.msra.mxu0 %v2620_v15 }
 0xa02   : > { %2382 = vmatprep.subr.bf16.mxu0 %v2844_v5 }
 0xa05   : > { %2383 = vmatpush3.bf16.msra.mxu0 %v2621_v22 }
 0xa06   : > { %2384 = vmatprep.subr.bf16.mxu0 %v2844_v5 }
 0xa09   : > { %2385 = vmatpush3.bf16.msra.mxu0 %v2622_v4 }
 0xa0c   : > { %2387 = vmatmul.mubr.bf16.vlgmr.msra.gmra.mrb[0].mxu0 %v1985_v17 }
 0xadf   : > { %v2091_v18 = vpop.f32.mrb[0].mxu0 }
 0xae0   : > { %v2092_v10 = vadd.f32 %v2345_v23, %v2091_v18  ;;  %v2388_v19 = vpop.f32.mrb[1].mxu0 }
 0xae1   : > { %v2094_v20 = vpop.f32.mrb[2].mxu0 }
 0xae2   : > { %v2354_v26 = vmul.f32 -1.442695, %v2092_v10  ;;  %v2389_v16 = vpop.f32.mrb[3].mxu0 }
 0xae4   : > { %2623 = vpow2.f32 %v2354_v26 }
 0xaee   : > { %v2624_v61 = vpop.eup %2623 }
 0xaef   : > { %v2100_v34 = vadd.f32 1.0, %v2624_v61 }
 0xaf1   : > { %2625 = vrcp.f32 %v2100_v34 }
 0xafb   : > { %v2626_v36 = vpop.eup %2625 }
 0xafc   : > { %2103 = vst [vmem:[#allocation12] sm:$0xff] %v2626_v36 }
 0xafd PF: > { %p2425_p6 = scmp.eq.s32.totalorder %s2986_s11, 1  ;;  %s2846_s7 = smov [#allocation12]  }
 0xafe   : > { %s2113_s10 = sshll.u32 %s2846_s7, 4  ;;  %s2114_s10 = int_to_ptr.vmem [resolvable:$true] %s2113_s10 }
 0xaff   : > { %s2743_s21 = scalar_lea.vmem %s2114_s10, 128  ;;  %p2750_p13 = scmp.lt.s32.totalorder %s2114_s10, %s2114_s10 }
 0xb00   : > { %p2744_p8 = scmp.ne.s32.totalorder %s2114_s10, %s2743_s21  ;;  %p2751_p11 = scmp.lt.s32.totalorder %s2743_s21, %s2743_s21 }
 0xb02   : > { %p2745_p2 = pnand %p2744_p8, %p2425_p6  ;;  %p2752_p12 = por %p2751_p11, %p2750_p13 }
 0xb04   : > { %p2746_p3 = pneg %p2745_p2 }
 0xb06   : > { %p2753_p10 = pnand %p2752_p12, %p2746_p3 }
 0xb08   : > { %2756 = shalt.err (!%p2753_p10)
}
 0xb09   : > { %s2757_s16 = scalar_lea.hbm %s3933_s6, 128 }
 0xb0a   : > { %p2758_p7 = scmp.ne.s32.totalorder %s3933_s6, %s2757_s16  ;;  %p2763_p1 = scmp.lt.u32.totalorder %s2757_s16, %s3933_s6 }
 0xb0c   : > { %p2759_p0 = pnand %p2758_p7, %p2425_p6 }
 0xb0e   : > { %p2760_p5 = pneg %p2759_p0 }
 0xb10   : > { %p2765_p4 = pnand %p2763_p1, %p2760_p5 }
 0xb12   : > { %2768 = shalt.err (!%p2765_p4)
}
 0xb13   : > { %2403 = dma.vmem_to_hbm [thread:$0]  (%p2425_p6), %s2114_s10, 128, %s3933_s6, [#allocation6]  }
 0xb14   : > { %2806 = dma.done.wait (%p2425_p6), [#allocation6], 128  }
 0xb15   : > { %2808 = vsyncadd (%p2425_p6), [#allocation6], 4294967168 }
 0xb16 PF: > { %s22_s26 = sadd.s32 1, %s2831_s26   ;;  %s3997_s1 = sld [smem:[#allocation19_spill]] }
 0xb17   : > { %p19_p9 = scmp.ge.s32.totalorder %s22_s26, 4   ;;  %s3998_s24 = sld [smem:[#allocation17_spill]] }
 0xb18   : > { %s3999_s25 = sld [smem:[#allocation18_spill]]  ;;  %s4000_s21 = smov %s2815_s22 }
 0xb19   : > { %s4001_s22 = smov %s2819_s23  ;;  %21 = sbr.rel (!%p19_p9) target bundleno = 9 (0x9), region = 160 }
 0xb1c   : > { %s4002_s23 = smov %s3997_s1 }
 0xb20   :  { %2126 = vsyncpa [#allocation5], 1 }
 0xb21   :  { %2128 = vsyncpa [#allocation5 + $0x1], 1 }
 0xb22   :  { %2129 = vsyncpa [#allocation8], 1 }
 0xb23   :  { %2131 = vsyncpa [#allocation8 + $0x1], 1 }
 0xb24   :  { %2132 = vsyncpa [#allocation11], 1 }
 0xb25   :  { %2133 = vsyncpa [#allocation6], 1 }
 0xb26   :  { %2135 = vsyncpa [#allocation6 + $0x1], 1 }

</bundles_post_ra>
